<compile_context>
chip_gen: v7x
topology: tpu7x:2x2x1
jax: 0.10.0
libtpu: 0.0.40
codegen_flags: <defaults>
</compile_context>

<pallas_src>
import functools

import jax
import jax.numpy as jnp
from jax.experimental import pallas as pl
from jax.experimental.pallas import tpu as pltpu

_SUBLANE = 8
_LANE = 128
_MATMUL_DTYPE = jnp.bfloat16  # MXU operand dtype; accumulation is f32.


def _round_up(x, m):
    return ((x + m - 1) // m) * m


def _pick_time_chunk(S, cap=32):
    """Largest divisor of S that is <= cap (amortizes per-grid-step overhead)."""
    for c in range(min(S, cap), 0, -1):
        if S % c == 0:
            return c
    return 1


def _pad_gate_weight_t(w_t, H, H_pad, K_pad):
    """(K, 4H) transposed LSTM weight -> (K_pad, 4*H_pad), per-gate padded."""
    K = w_t.shape[0]
    w4 = w_t.reshape(K, 4, H)
    w4 = jnp.pad(w4, ((0, K_pad - K), (0, 0), (0, H_pad - H)))
    return w4.reshape(K_pad, 4 * H_pad)


def _pad_gate_bias(b, H, H_pad):
    """(1, 4H) fused bias -> (1, 4*H_pad), per-gate padded."""
    b4 = b.reshape(4, H)
    b4 = jnp.pad(b4, ((0, 0), (0, H_pad - H)))
    return b4.reshape(1, 4 * H_pad)


def _lstm_kernel(x_ref, wih_ref, whh_ref, b_ref,
                 out_ref, h_out_ref, c_out_ref,
                 gx_scratch, h_scratch, c_scratch,
                 *, t_chunk, b_pad, h_pad):
    chunk = pl.program_id(0)

    @pl.when(chunk == 0)
    def _():
        h_scratch[...] = jnp.zeros_like(h_scratch)
        c_scratch[...] = jnp.zeros_like(c_scratch)

    # ---- Phase 1: hoisted input projection for the whole chunk (one big MXU matmul).
    # x_ref: (t_chunk * b_pad, E_pad) bf16; wih_ref: (E_pad, 4*H_pad) bf16.
    gx_scratch[...] = (
        jnp.dot(x_ref[...], wih_ref[...], preferred_element_type=jnp.float32)
        + b_ref[...])

    wh = whh_ref[...]  # (H_pad, 4*H_pad) bf16, resident in VMEM.
    H = h_pad

    # ---- Phase 2: serial recurrence, only h @ W_hh^T on the critical path.
    def step(t, carry):
        h, c = carry                               # f32 (b_pad, H_pad)
        row0 = pl.multiple_of(t * b_pad, b_pad)    # sublane-aligned slice start
        gx = gx_scratch[pl.ds(row0, b_pad), :]     # (b_pad, 4*H_pad) f32
        gates = gx + jnp.dot(h.astype(wh.dtype), wh,
                             preferred_element_type=jnp.float32)
        # 128-lane-aligned gate slices (torch order i, f, g, o).
        i_g = jax.nn.sigmoid(gates[:, 0 * H:1 * H])
        f_g = jax.nn.sigmoid(gates[:, 1 * H:2 * H])
        g_g = jnp.tanh(gates[:, 2 * H:3 * H])
        o_g = jax.nn.sigmoid(gates[:, 3 * H:4 * H])
        c_new = f_g * c + i_g * g_g
        h_new = o_g * jnp.tanh(c_new)
        out_ref[pl.ds(row0, b_pad), :] = h_new     # lane-dense (8,128) store
        return h_new, c_new

    h0 = h_scratch[...]
    c0 = c_scratch[...]
    h_last, c_last = jax.lax.fori_loop(0, t_chunk, step, (h0, c0), unroll=True)

    h_scratch[...] = h_last
    c_scratch[...] = c_last

    @pl.when(chunk == pl.num_programs(0) - 1)
    def _():
        h_out_ref[...] = h_last
        c_out_ref[...] = c_last


def lstm_pallas(x_sbe, w_ih_t_p, w_hh_t_p, bias_p, *, hidden_size, t_chunk=None):
    """Run the LSTM recurrence.

    x_sbe:    (S, B, E) f32 time-major embedded input.
    w_ih_t_p: (E_pad, 4*H_pad) bf16 padded W_ih^T (gate-blocked).
    w_hh_t_p: (H_pad, 4*H_pad) bf16 padded W_hh^T (gate-blocked).
    bias_p:   (1, 4*H_pad) f32 padded fused bias.
    Returns: outputs (B, S, H) f32, final h (B, H), final c (B, H).
    """
    S, B, E = x_sbe.shape
    H = hidden_size
    E_pad = w_ih_t_p.shape[0]
    H_pad = w_hh_t_p.shape[0]
    B_pad = _round_up(max(B, _SUBLANE), _SUBLANE)

    if t_chunk is None:
        t_chunk = _pick_time_chunk(S)
    assert S % t_chunk == 0
    n_chunks = S // t_chunk

    # Pad batch/embed; flatten time into the sublane axis -> (S*B_pad, E_pad).
    x_p = jnp.pad(x_sbe, ((0, 0), (0, B_pad - B), (0, E_pad - E)))
    x2d = x_p.reshape(S * B_pad, E_pad).astype(_MATMUL_DTYPE)

    kernel = functools.partial(_lstm_kernel,
                               t_chunk=t_chunk, b_pad=B_pad, h_pad=H_pad)

    out_shapes = (
        jax.ShapeDtypeStruct((S * B_pad, H_pad), jnp.float32),  # all hidden states
        jax.ShapeDtypeStruct((B_pad, H_pad), jnp.float32),      # final h
        jax.ShapeDtypeStruct((B_pad, H_pad), jnp.float32),      # final c
    )

    # NOTE: for realistic E/H (e.g. 1024+) on v7x, single-buffer the resident
    # weight specs (pipeline_mode=pl.Buffered(1)) and set vmem_limit_bytes.
    grid_spec = pltpu.PrefetchScalarGridSpec(
        num_scalar_prefetch=0,
        grid=(n_chunks,),
        in_specs=[
            pl.BlockSpec((t_chunk * B_pad, E_pad), lambda c: (c, 0)),  # x chunk
            pl.BlockSpec((E_pad, 4 * H_pad), lambda c: (0, 0)),        # W_ih^T
            pl.BlockSpec((H_pad, 4 * H_pad), lambda c: (0, 0)),        # W_hh^T
            pl.BlockSpec((1, 4 * H_pad), lambda c: (0, 0)),            # bias
        ],
        out_specs=(
            pl.BlockSpec((t_chunk * B_pad, H_pad), lambda c: (c, 0)),  # outputs
            pl.BlockSpec((B_pad, H_pad), lambda c: (0, 0)),            # final h
            pl.BlockSpec((B_pad, H_pad), lambda c: (0, 0)),            # final c
        ),
        scratch_shapes=[
            pltpu.VMEM((t_chunk * B_pad, 4 * H_pad), jnp.float32),  # hoisted gates_x
            pltpu.VMEM((B_pad, H_pad), jnp.float32),                # h carry
            pltpu.VMEM((B_pad, H_pad), jnp.float32),                # c carry
        ],
    )

    outs2d, h_f, c_f = pl.pallas_call(
        kernel,
        out_shape=out_shapes,
        grid_spec=grid_spec,
        compiler_params=pltpu.CompilerParams(
            dimension_semantics=("arbitrary",)),   # sequential recurrence
    )(x2d, w_ih_t_p, w_hh_t_p, bias_p)

    outputs = outs2d.reshape(S, B_pad, H_pad)[:, :B, :H]
    outputs = jnp.transpose(outputs, (1, 0, 2))    # (B, S, H) batch_first
    return outputs, h_f[:B, :H], c_f[:B, :H]


class EncoderRNNPallas:
    """Mirrors EncoderRNN(vocab_size, embed_size, hidden_size, pad_idx)."""

    def __init__(self, vocab_size, embed_size, hidden_size, pad_idx, key):
        self.vocab_size = vocab_size
        self.embed_size = embed_size
        self.hidden_size = hidden_size
        self.pad_idx = pad_idx

        k_emb, k_wih, k_whh, k_bih, k_bhh = jax.random.split(key, 5)
        scale = 1.0 / jnp.sqrt(hidden_size)

        emb = jax.random.normal(k_emb, (vocab_size, embed_size), jnp.float32)
        # padding_idx row is zero, as in nn.Embedding(padding_idx=...)
        self.embedding = emb.at[pad_idx].set(0.0)

        # PyTorch LSTM weights are (4H, E) / (4H, H); store transposed for x @ W^T.
        w_ih = jax.random.uniform(k_wih, (4 * hidden_size, embed_size),
                                  jnp.float32, -scale, scale)
        w_hh = jax.random.uniform(k_whh, (4 * hidden_size, hidden_size),
                                  jnp.float32, -scale, scale)
        b_ih = jax.random.uniform(k_bih, (4 * hidden_size,), jnp.float32, -scale, scale)
        b_hh = jax.random.uniform(k_bhh, (4 * hidden_size,), jnp.float32, -scale, scale)

        self.w_ih_t = w_ih.T                                   # (E, 4H) f32 (reference)
        self.w_hh_t = w_hh.T                                   # (H, 4H) f32 (reference)
        self.bias = (b_ih + b_hh).reshape(1, 4 * hidden_size)  # (1, 4H) f32 (reference)

        # Padded, gate-blocked, lane-aligned kernel weights (bf16 MXU operands).
        H_pad = _round_up(hidden_size, _LANE)
        E_pad = _round_up(embed_size, _LANE)
        self.w_ih_t_p = _pad_gate_weight_t(self.w_ih_t, hidden_size, H_pad,
                                           E_pad).astype(_MATMUL_DTYPE)
        self.w_hh_t_p = _pad_gate_weight_t(self.w_hh_t, hidden_size, H_pad,
                                           H_pad).astype(_MATMUL_DTYPE)
        self.bias_p = _pad_gate_bias(self.bias, hidden_size, H_pad)  # f32

    def __call__(self, src):
        # src: (B, S) int32 token ids.
        # Gather time-major directly (transpose the tiny int index matrix, not
        # the f32 activations).  The table gather itself stays in plain JAX.
        # TODO(synk): embedding-table gather (data-dependent HBM rows) is left in JAX.
        x_sbe = self.embedding[src.T]                    # (S, B, E)
        outputs, h, c = lstm_pallas(x_sbe, self.w_ih_t_p, self.w_hh_t_p,
                                    self.bias_p, hidden_size=self.hidden_size)
        return outputs, (h[None], c[None])               # h, c: (1, B, H)


def _reference_lstm(x_sbe, w_ih_t, w_hh_t, bias, mm_dtype=jnp.float32):
    """Pure-JAX reference (mirrors the kernel's matmul-operand rounding)."""
    S, B, E = x_sbe.shape
    H = w_hh_t.shape[0]

    def q(v):
        return v.astype(mm_dtype).astype(jnp.float32)

    def step(carry, x_t):
        h, c = carry
        gates = q(x_t) @ w_ih_t + q(h) @ w_hh_t + bias
        i = jax.nn.sigmoid(gates[:, 0 * H:1 * H])
        f = jax.nn.sigmoid(gates[:, 1 * H:2 * H])
        g = jnp.tanh(gates[:, 2 * H:3 * H])
        o = jax.nn.sigmoid(gates[:, 3 * H:4 * H])
        c = f * c + i * g
        h = o * jnp.tanh(c)
        return (h, c), h

    init = (jnp.zeros((B, H), jnp.float32), jnp.zeros((B, H), jnp.float32))
    (h, c), outs = jax.lax.scan(step, init, x_sbe)
    return outs, h, c


if __name__ == "__main__":
    VOCAB, EMBED, HIDDEN, PAD = 50, 32, 32, 0
    B, S = 2, 8

    key = jax.random.PRNGKey(0)
    k_model, k_src = jax.random.split(key)

    model = EncoderRNNPallas(VOCAB, EMBED, HIDDEN, PAD, k_model)
    src = jax.random.randint(k_src, (B, S), 0, VOCAB, dtype=jnp.int32)

    outputs, (h, c) = model(src)
    jax.block_until_ready((outputs, h, c))

    assert outputs.shape == (B, S, HIDDEN)
    assert h.shape == (1, B, HIDDEN) and c.shape == (1, B, HIDDEN)

    # Cross-check against a pure-JAX reference that uses the same bf16-rounded
    # matmul operands (weights / x / h) with f32 everywhere else.
    x_sbe = model.embedding[src.T]
    wih_q = model.w_ih_t.astype(_MATMUL_DTYPE).astype(jnp.float32)
    whh_q = model.w_hh_t.astype(_MATMUL_DTYPE).astype(jnp.float32)
    ref_outs, ref_h, ref_c = _reference_lstm(x_sbe, wih_q, whh_q, model.bias,
                                             mm_dtype=_MATMUL_DTYPE)
    assert jnp.allclose(jnp.transpose(ref_outs, (1, 0, 2)), outputs,
                        atol=5e-3, rtol=1e-3)
    assert jnp.allclose(ref_h, h[0], atol=5e-3, rtol=1e-3)
    assert jnp.allclose(ref_c, c[0], atol=5e-3, rtol=1e-3)

    print("KERNEL_OK")
</pallas_src>

<mosaic_0001>
module attributes {stable_mosaic.version = 11 : i64} {
  func.func @_lstm_kernel(%arg0: i32, %arg1: memref<64x128xbf16, #tpu.memory_space<vmem>>, %arg2: memref<128x512xbf16, #tpu.memory_space<vmem>>, %arg3: memref<128x512xbf16, #tpu.memory_space<vmem>>, %arg4: memref<1x512xf32, #tpu.memory_space<vmem>>, %arg5: memref<64x128xf32, #tpu.memory_space<vmem>>, %arg6: memref<8x128xf32, #tpu.memory_space<vmem>>, %arg7: memref<8x128xf32, #tpu.memory_space<vmem>>, %arg8: memref<64x512xf32, #tpu.memory_space<vmem>>, %arg9: memref<8x128xf32, #tpu.memory_space<vmem>>, %arg10: memref<8x128xf32, #tpu.memory_space<vmem>>) attributes {dimension_semantics = [#tpu.dimension_semantics<arbitrary>], iteration_bounds = array<i64: 1>, scalar_prefetch = 0 : i64, scratch_operands = 3 : i64, tpu.core_type = #tpu.core_type<tc>, window_params = [{transform_indices = @transform_0, window_bounds = array<i64: 64, 128>}, {pipeline_mode = #tpu.pipeline_mode<synchronous>, transform_indices = @transform_1, window_bounds = array<i64: 128, 512>}, {pipeline_mode = #tpu.pipeline_mode<synchronous>, transform_indices = @transform_2, window_bounds = array<i64: 128, 512>}, {pipeline_mode = #tpu.pipeline_mode<synchronous>, transform_indices = @transform_3, window_bounds = array<i64: 1, 512>}, {transform_indices = @transform_4, window_bounds = array<i64: 64, 128>}, {pipeline_mode = #tpu.pipeline_mode<synchronous>, transform_indices = @transform_5, window_bounds = array<i64: 8, 128>}, {pipeline_mode = #tpu.pipeline_mode<synchronous>, transform_indices = @transform_6, window_bounds = array<i64: 8, 128>}]} {
    %c0_i32 = arith.constant 0 : i32
    %0 = arith.cmpi eq, %arg0, %c0_i32 : i32
    %1 = arith.extui %0 : i1 to i32
    %c0_i32_0 = arith.constant 0 : i32
    %2 = arith.cmpi ne, %1, %c0_i32_0 : i32
    scf.if %2 {
      %cst_77 = arith.constant 0.000000e+00 : f32
      %290 = vector.broadcast %cst_77 : f32 to vector<8x128xf32>
      %c0_78 = arith.constant 0 : index
      %c0_79 = arith.constant 0 : index
      %291 = vector.load %arg9[%c0_78, %c0_79] : memref<8x128xf32, #tpu.memory_space<vmem>>, vector<8x128xf32>
      tpu.vector_store %arg9[%c0_78, %c0_79], %290 {strides = array<i32>} : memref<8x128xf32, #tpu.memory_space<vmem>>, vector<8x128xf32>,
      %cst_80 = arith.constant 0.000000e+00 : f32
      %292 = vector.broadcast %cst_80 : f32 to vector<8x128xf32>
      %c0_81 = arith.constant 0 : index
      %c0_82 = arith.constant 0 : index
      %293 = vector.load %arg10[%c0_81, %c0_82] : memref<8x128xf32, #tpu.memory_space<vmem>>, vector<8x128xf32>
      tpu.vector_store %arg10[%c0_81, %c0_82], %292 {strides = array<i32>} : memref<8x128xf32, #tpu.memory_space<vmem>>, vector<8x128xf32>,
    } else {
    }
    %c0 = arith.constant 0 : index
    %c0_1 = arith.constant 0 : index
    %3 = vector.load %arg1[%c0, %c0_1] : memref<64x128xbf16, #tpu.memory_space<vmem>>, vector<64x128xbf16>
    %c0_2 = arith.constant 0 : index
    %c0_3 = arith.constant 0 : index
    %4 = vector.load %arg2[%c0_2, %c0_3] : memref<128x512xbf16, #tpu.memory_space<vmem>>, vector<128x512xbf16>
    %cst = arith.constant dense<0.000000e+00> : vector<64x512xf32>
    %5 = tpu.matmul %3, %4, %cst {dimension_numbers = #tpu.dot_dimension_numbers<[1], [0], [0], [1], [0, 0, 1, 1], [], []>} : vector<64x128xbf16>, vector<128x512xbf16>, vector<64x512xf32> -> vector<64x512xf32>
    %c0_4 = arith.constant 0 : index
    %c0_5 = arith.constant 0 : index
    %6 = vector.load %arg4[%c0_4, %c0_5] : memref<1x512xf32, #tpu.memory_space<vmem>>, vector<1x512xf32>
    %7 = vector.broadcast %6 : vector<1x512xf32> to vector<64x512xf32>
    %8 = arith.addf %5, %7 : vector<64x512xf32>
    %c0_6 = arith.constant 0 : index
    %c0_7 = arith.constant 0 : index
    %9 = vector.load %arg8[%c0_6, %c0_7] : memref<64x512xf32, #tpu.memory_space<vmem>>, vector<64x512xf32>
    tpu.vector_store %arg8[%c0_6, %c0_7], %8 {strides = array<i32>} : memref<64x512xf32, #tpu.memory_space<vmem>>, vector<64x512xf32>,
    %c0_8 = arith.constant 0 : index
    %c0_9 = arith.constant 0 : index
    %10 = vector.load %arg3[%c0_8, %c0_9] : memref<128x512xbf16, #tpu.memory_space<vmem>>, vector<128x512xbf16>
    %c0_10 = arith.constant 0 : index
    %c0_11 = arith.constant 0 : index
    %11 = vector.load %arg9[%c0_10, %c0_11] : memref<8x128xf32, #tpu.memory_space<vmem>>, vector<8x128xf32>
    %c0_12 = arith.constant 0 : index
    %c0_13 = arith.constant 0 : index
    %12 = vector.load %arg10[%c0_12, %c0_13] : memref<8x128xf32, #tpu.memory_space<vmem>>, vector<8x128xf32>
    %c0_i32_14 = arith.constant 0 : i32
    %c8_i32 = arith.constant 8 : i32
    %13 = arith.muli %c0_i32_14, %c8_i32 : i32
    %14 = tpu.assume_multiple %13, 8 : i32
    %15 = arith.index_cast %14 : i32 to index
    %c0_15 = arith.constant 0 : index
    %16 = vector.load %arg8[%15, %c0_15] : memref<64x512xf32, #tpu.memory_space<vmem>>, vector<8x512xf32>
    %17 = arith.truncf %11 : vector<8x128xf32> to vector<8x128xbf16>
    %cst_16 = arith.constant dense<0.000000e+00> : vector<8x512xf32>
    %18 = tpu.matmul %17, %10, %cst_16 {dimension_numbers = #tpu.dot_dimension_numbers<[1], [0], [0], [1], [0, 0, 1, 1], [], []>} : vector<8x128xbf16>, vector<128x512xbf16>, vector<8x512xf32> -> vector<8x512xf32>
    %19 = arith.addf %16, %18 : vector<8x512xf32>
    %20 = vector.extract_strided_slice %19 {offsets = [0, 0], sizes = [8, 128], strides = [1, 1]} : vector<8x512xf32> to vector<8x128xf32>
    %21 = arith.negf %20 : vector<8x128xf32>
    %22 = math.exp %21 : vector<8x128xf32>
    %cst_17 = arith.constant 1.000000e+00 : f32
    %23 = vector.broadcast %cst_17 : f32 to vector<8x128xf32>
    %24 = arith.addf %23, %22 : vector<8x128xf32>
    %25 = arith.divf %23, %24 : vector<8x128xf32>
    %26 = vector.extract_strided_slice %19 {offsets = [0, 128], sizes = [8, 128], strides = [1, 1]} : vector<8x512xf32> to vector<8x128xf32>
    %27 = arith.negf %26 : vector<8x128xf32>
    %28 = math.exp %27 : vector<8x128xf32>
    %cst_18 = arith.constant 1.000000e+00 : f32
    %29 = vector.broadcast %cst_18 : f32 to vector<8x128xf32>
    %30 = arith.addf %29, %28 : vector<8x128xf32>
    %31 = arith.divf %29, %30 : vector<8x128xf32>
    %32 = vector.extract_strided_slice %19 {offsets = [0, 256], sizes = [8, 128], strides = [1, 1]} : vector<8x512xf32> to vector<8x128xf32>
    %33 = math.tanh %32 : vector<8x128xf32>
    %34 = vector.extract_strided_slice %19 {offsets = [0, 384], sizes = [8, 128], strides = [1, 1]} : vector<8x512xf32> to vector<8x128xf32>
    %35 = arith.negf %34 : vector<8x128xf32>
    %36 = math.exp %35 : vector<8x128xf32>
    %cst_19 = arith.constant 1.000000e+00 : f32
    %37 = vector.broadcast %cst_19 : f32 to vector<8x128xf32>
    %38 = arith.addf %37, %36 : vector<8x128xf32>
    %39 = arith.divf %37, %38 : vector<8x128xf32>
    %40 = arith.mulf %31, %12 : vector<8x128xf32>
    %41 = arith.mulf %25, %33 : vector<8x128xf32>
    %42 = arith.addf %40, %41 : vector<8x128xf32>
    %43 = math.tanh %42 : vector<8x128xf32>
    %44 = arith.mulf %39, %43 : vector<8x128xf32>
    %45 = arith.index_cast %14 : i32 to index
    %c0_20 = arith.constant 0 : index
    %46 = vector.load %arg5[%45, %c0_20] : memref<64x128xf32, #tpu.memory_space<vmem>>, vector<8x128xf32>
    tpu.vector_store %arg5[%45, %c0_20], %44 {strides = array<i32>} : memref<64x128xf32, #tpu.memory_space<vmem>>, vector<8x128xf32>,
    %c1_i32 = arith.constant 1 : i32
    %c8_i32_21 = arith.constant 8 : i32
    %47 = arith.muli %c1_i32, %c8_i32_21 : i32
    %48 = tpu.assume_multiple %47, 8 : i32
    %49 = arith.index_cast %48 : i32 to index
    %c0_22 = arith.constant 0 : index
    %50 = vector.load %arg8[%49, %c0_22] : memref<64x512xf32, #tpu.memory_space<vmem>>, vector<8x512xf32>
    %51 = arith.truncf %44 : vector<8x128xf32> to vector<8x128xbf16>
    %cst_23 = arith.constant dense<0.000000e+00> : vector<8x512xf32>
    %52 = tpu.matmul %51, %10, %cst_23 {dimension_numbers = #tpu.dot_dimension_numbers<[1], [0], [0], [1], [0, 0, 1, 1], [], []>} : vector<8x128xbf16>, vector<128x512xbf16>, vector<8x512xf32> -> vector<8x512xf32>
    %53 = arith.addf %50, %52 : vector<8x512xf32>
    %54 = vector.extract_strided_slice %53 {offsets = [0, 0], sizes = [8, 128], strides = [1, 1]} : vector<8x512xf32> to vector<8x128xf32>
    %55 = arith.negf %54 : vector<8x128xf32>
    %56 = math.exp %55 : vector<8x128xf32>
    %cst_24 = arith.constant 1.000000e+00 : f32
    %57 = vector.broadcast %cst_24 : f32 to vector<8x128xf32>
    %58 = arith.addf %57, %56 : vector<8x128xf32>
    %59 = arith.divf %57, %58 : vector<8x128xf32>
    %60 = vector.extract_strided_slice %53 {offsets = [0, 128], sizes = [8, 128], strides = [1, 1]} : vector<8x512xf32> to vector<8x128xf32>
    %61 = arith.negf %60 : vector<8x128xf32>
    %62 = math.exp %61 : vector<8x128xf32>
    %cst_25 = arith.constant 1.000000e+00 : f32
    %63 = vector.broadcast %cst_25 : f32 to vector<8x128xf32>
    %64 = arith.addf %63, %62 : vector<8x128xf32>
    %65 = arith.divf %63, %64 : vector<8x128xf32>
    %66 = vector.extract_strided_slice %53 {offsets = [0, 256], sizes = [8, 128], strides = [1, 1]} : vector<8x512xf32> to vector<8x128xf32>
    %67 = math.tanh %66 : vector<8x128xf32>
    %68 = vector.extract_strided_slice %53 {offsets = [0, 384], sizes = [8, 128], strides = [1, 1]} : vector<8x512xf32> to vector<8x128xf32>
    %69 = arith.negf %68 : vector<8x128xf32>
    %70 = math.exp %69 : vector<8x128xf32>
    %cst_26 = arith.constant 1.000000e+00 : f32
    %71 = vector.broadcast %cst_26 : f32 to vector<8x128xf32>
    %72 = arith.addf %71, %70 : vector<8x128xf32>
    %73 = arith.divf %71, %72 : vector<8x128xf32>
    %74 = arith.mulf %65, %42 : vector<8x128xf32>
    %75 = arith.mulf %59, %67 : vector<8x128xf32>
    %76 = arith.addf %74, %75 : vector<8x128xf32>
    %77 = math.tanh %76 : vector<8x128xf32>
    %78 = arith.mulf %73, %77 : vector<8x128xf32>
    %79 = arith.index_cast %48 : i32 to index
    %c0_27 = arith.constant 0 : index
    %80 = vector.load %arg5[%79, %c0_27] : memref<64x128xf32, #tpu.memory_space<vmem>>, vector<8x128xf32>
    tpu.vector_store %arg5[%79, %c0_27], %78 {strides = array<i32>} : memref<64x128xf32, #tpu.memory_space<vmem>>, vector<8x128xf32>,
    %c2_i32 = arith.constant 2 : i32
    %c8_i32_28 = arith.constant 8 : i32
    %81 = arith.muli %c2_i32, %c8_i32_28 : i32
    %82 = tpu.assume_multiple %81, 8 : i32
    %83 = arith.index_cast %82 : i32 to index
    %c0_29 = arith.constant 0 : index
    %84 = vector.load %arg8[%83, %c0_29] : memref<64x512xf32, #tpu.memory_space<vmem>>, vector<8x512xf32>
    %85 = arith.truncf %78 : vector<8x128xf32> to vector<8x128xbf16>
    %cst_30 = arith.constant dense<0.000000e+00> : vector<8x512xf32>
    %86 = tpu.matmul %85, %10, %cst_30 {dimension_numbers = #tpu.dot_dimension_numbers<[1], [0], [0], [1], [0, 0, 1, 1], [], []>} : vector<8x128xbf16>, vector<128x512xbf16>, vector<8x512xf32> -> vector<8x512xf32>
    %87 = arith.addf %84, %86 : vector<8x512xf32>
    %88 = vector.extract_strided_slice %87 {offsets = [0, 0], sizes = [8, 128], strides = [1, 1]} : vector<8x512xf32> to vector<8x128xf32>
    %89 = arith.negf %88 : vector<8x128xf32>
    %90 = math.exp %89 : vector<8x128xf32>
    %cst_31 = arith.constant 1.000000e+00 : f32
    %91 = vector.broadcast %cst_31 : f32 to vector<8x128xf32>
    %92 = arith.addf %91, %90 : vector<8x128xf32>
    %93 = arith.divf %91, %92 : vector<8x128xf32>
    %94 = vector.extract_strided_slice %87 {offsets = [0, 128], sizes = [8, 128], strides = [1, 1]} : vector<8x512xf32> to vector<8x128xf32>
    %95 = arith.negf %94 : vector<8x128xf32>
    %96 = math.exp %95 : vector<8x128xf32>
    %cst_32 = arith.constant 1.000000e+00 : f32
    %97 = vector.broadcast %cst_32 : f32 to vector<8x128xf32>
    %98 = arith.addf %97, %96 : vector<8x128xf32>
    %99 = arith.divf %97, %98 : vector<8x128xf32>
    %100 = vector.extract_strided_slice %87 {offsets = [0, 256], sizes = [8, 128], strides = [1, 1]} : vector<8x512xf32> to vector<8x128xf32>
    %101 = math.tanh %100 : vector<8x128xf32>
    %102 = vector.extract_strided_slice %87 {offsets = [0, 384], sizes = [8, 128], strides = [1, 1]} : vector<8x512xf32> to vector<8x128xf32>
    %103 = arith.negf %102 : vector<8x128xf32>
    %104 = math.exp %103 : vector<8x128xf32>
    %cst_33 = arith.constant 1.000000e+00 : f32
    %105 = vector.broadcast %cst_33 : f32 to vector<8x128xf32>
    %106 = arith.addf %105, %104 : vector<8x128xf32>
    %107 = arith.divf %105, %106 : vector<8x128xf32>
    %108 = arith.mulf %99, %76 : vector<8x128xf32>
    %109 = arith.mulf %93, %101 : vector<8x128xf32>
    %110 = arith.addf %108, %109 : vector<8x128xf32>
    %111 = math.tanh %110 : vector<8x128xf32>
    %112 = arith.mulf %107, %111 : vector<8x128xf32>
    %113 = arith.index_cast %82 : i32 to index
    %c0_34 = arith.constant 0 : index
    %114 = vector.load %arg5[%113, %c0_34] : memref<64x128xf32, #tpu.memory_space<vmem>>, vector<8x128xf32>
    tpu.vector_store %arg5[%113, %c0_34], %112 {strides = array<i32>} : memref<64x128xf32, #tpu.memory_space<vmem>>, vector<8x128xf32>,
    %c3_i32 = arith.constant 3 : i32
    %c8_i32_35 = arith.constant 8 : i32
    %115 = arith.muli %c3_i32, %c8_i32_35 : i32
    %116 = tpu.assume_multiple %115, 8 : i32
    %117 = arith.index_cast %116 : i32 to index
    %c0_36 = arith.constant 0 : index
    %118 = vector.load %arg8[%117, %c0_36] : memref<64x512xf32, #tpu.memory_space<vmem>>, vector<8x512xf32>
    %119 = arith.truncf %112 : vector<8x128xf32> to vector<8x128xbf16>
    %cst_37 = arith.constant dense<0.000000e+00> : vector<8x512xf32>
    %120 = tpu.matmul %119, %10, %cst_37 {dimension_numbers = #tpu.dot_dimension_numbers<[1], [0], [0], [1], [0, 0, 1, 1], [], []>} : vector<8x128xbf16>, vector<128x512xbf16>, vector<8x512xf32> -> vector<8x512xf32>
    %121 = arith.addf %118, %120 : vector<8x512xf32>
    %122 = vector.extract_strided_slice %121 {offsets = [0, 0], sizes = [8, 128], strides = [1, 1]} : vector<8x512xf32> to vector<8x128xf32>
    %123 = arith.negf %122 : vector<8x128xf32>
    %124 = math.exp %123 : vector<8x128xf32>
    %cst_38 = arith.constant 1.000000e+00 : f32
    %125 = vector.broadcast %cst_38 : f32 to vector<8x128xf32>
    %126 = arith.addf %125, %124 : vector<8x128xf32>
    %127 = arith.divf %125, %126 : vector<8x128xf32>
    %128 = vector.extract_strided_slice %121 {offsets = [0, 128], sizes = [8, 128], strides = [1, 1]} : vector<8x512xf32> to vector<8x128xf32>
    %129 = arith.negf %128 : vector<8x128xf32>
    %130 = math.exp %129 : vector<8x128xf32>
    %cst_39 = arith.constant 1.000000e+00 : f32
    %131 = vector.broadcast %cst_39 : f32 to vector<8x128xf32>
    %132 = arith.addf %131, %130 : vector<8x128xf32>
    %133 = arith.divf %131, %132 : vector<8x128xf32>
    %134 = vector.extract_strided_slice %121 {offsets = [0, 256], sizes = [8, 128], strides = [1, 1]} : vector<8x512xf32> to vector<8x128xf32>
    %135 = math.tanh %134 : vector<8x128xf32>
    %136 = vector.extract_strided_slice %121 {offsets = [0, 384], sizes = [8, 128], strides = [1, 1]} : vector<8x512xf32> to vector<8x128xf32>
    %137 = arith.negf %136 : vector<8x128xf32>
    %138 = math.exp %137 : vector<8x128xf32>
    %cst_40 = arith.constant 1.000000e+00 : f32
    %139 = vector.broadcast %cst_40 : f32 to vector<8x128xf32>
    %140 = arith.addf %139, %138 : vector<8x128xf32>
    %141 = arith.divf %139, %140 : vector<8x128xf32>
    %142 = arith.mulf %133, %110 : vector<8x128xf32>
    %143 = arith.mulf %127, %135 : vector<8x128xf32>
    %144 = arith.addf %142, %143 : vector<8x128xf32>
    %145 = math.tanh %144 : vector<8x128xf32>
    %146 = arith.mulf %141, %145 : vector<8x128xf32>
    %147 = arith.index_cast %116 : i32 to index
    %c0_41 = arith.constant 0 : index
    %148 = vector.load %arg5[%147, %c0_41] : memref<64x128xf32, #tpu.memory_space<vmem>>, vector<8x128xf32>
    tpu.vector_store %arg5[%147, %c0_41], %146 {strides = array<i32>} : memref<64x128xf32, #tpu.memory_space<vmem>>, vector<8x128xf32>,
    %c4_i32 = arith.constant 4 : i32
    %c8_i32_42 = arith.constant 8 : i32
    %149 = arith.muli %c4_i32, %c8_i32_42 : i32
    %150 = tpu.assume_multiple %149, 8 : i32
    %151 = arith.index_cast %150 : i32 to index
    %c0_43 = arith.constant 0 : index
    %152 = vector.load %arg8[%151, %c0_43] : memref<64x512xf32, #tpu.memory_space<vmem>>, vector<8x512xf32>
    %153 = arith.truncf %146 : vector<8x128xf32> to vector<8x128xbf16>
    %cst_44 = arith.constant dense<0.000000e+00> : vector<8x512xf32>
    %154 = tpu.matmul %153, %10, %cst_44 {dimension_numbers = #tpu.dot_dimension_numbers<[1], [0], [0], [1], [0, 0, 1, 1], [], []>} : vector<8x128xbf16>, vector<128x512xbf16>, vector<8x512xf32> -> vector<8x512xf32>
    %155 = arith.addf %152, %154 : vector<8x512xf32>
    %156 = vector.extract_strided_slice %155 {offsets = [0, 0], sizes = [8, 128], strides = [1, 1]} : vector<8x512xf32> to vector<8x128xf32>
    %157 = arith.negf %156 : vector<8x128xf32>
    %158 = math.exp %157 : vector<8x128xf32>
    %cst_45 = arith.constant 1.000000e+00 : f32
    %159 = vector.broadcast %cst_45 : f32 to vector<8x128xf32>
    %160 = arith.addf %159, %158 : vector<8x128xf32>
    %161 = arith.divf %159, %160 : vector<8x128xf32>
    %162 = vector.extract_strided_slice %155 {offsets = [0, 128], sizes = [8, 128], strides = [1, 1]} : vector<8x512xf32> to vector<8x128xf32>
    %163 = arith.negf %162 : vector<8x128xf32>
    %164 = math.exp %163 : vector<8x128xf32>
    %cst_46 = arith.constant 1.000000e+00 : f32
    %165 = vector.broadcast %cst_46 : f32 to vector<8x128xf32>
    %166 = arith.addf %165, %164 : vector<8x128xf32>
    %167 = arith.divf %165, %166 : vector<8x128xf32>
    %168 = vector.extract_strided_slice %155 {offsets = [0, 256], sizes = [8, 128], strides = [1, 1]} : vector<8x512xf32> to vector<8x128xf32>
    %169 = math.tanh %168 : vector<8x128xf32>
    %170 = vector.extract_strided_slice %155 {offsets = [0, 384], sizes = [8, 128], strides = [1, 1]} : vector<8x512xf32> to vector<8x128xf32>
    %171 = arith.negf %170 : vector<8x128xf32>
    %172 = math.exp %171 : vector<8x128xf32>
    %cst_47 = arith.constant 1.000000e+00 : f32
    %173 = vector.broadcast %cst_47 : f32 to vector<8x128xf32>
    %174 = arith.addf %173, %172 : vector<8x128xf32>
    %175 = arith.divf %173, %174 : vector<8x128xf32>
    %176 = arith.mulf %167, %144 : vector<8x128xf32>
    %177 = arith.mulf %161, %169 : vector<8x128xf32>
    %178 = arith.addf %176, %177 : vector<8x128xf32>
    %179 = math.tanh %178 : vector<8x128xf32>
    %180 = arith.mulf %175, %179 : vector<8x128xf32>
    %181 = arith.index_cast %150 : i32 to index
    %c0_48 = arith.constant 0 : index
    %182 = vector.load %arg5[%181, %c0_48] : memref<64x128xf32, #tpu.memory_space<vmem>>, vector<8x128xf32>
    tpu.vector_store %arg5[%181, %c0_48], %180 {strides = array<i32>} : memref<64x128xf32, #tpu.memory_space<vmem>>, vector<8x128xf32>,
    %c5_i32 = arith.constant 5 : i32
    %c8_i32_49 = arith.constant 8 : i32
    %183 = arith.muli %c5_i32, %c8_i32_49 : i32
    %184 = tpu.assume_multiple %183, 8 : i32
    %185 = arith.index_cast %184 : i32 to index
    %c0_50 = arith.constant 0 : index
    %186 = vector.load %arg8[%185, %c0_50] : memref<64x512xf32, #tpu.memory_space<vmem>>, vector<8x512xf32>
    %187 = arith.truncf %180 : vector<8x128xf32> to vector<8x128xbf16>
    %cst_51 = arith.constant dense<0.000000e+00> : vector<8x512xf32>
    %188 = tpu.matmul %187, %10, %cst_51 {dimension_numbers = #tpu.dot_dimension_numbers<[1], [0], [0], [1], [0, 0, 1, 1], [], []>} : vector<8x128xbf16>, vector<128x512xbf16>, vector<8x512xf32> -> vector<8x512xf32>
    %189 = arith.addf %186, %188 : vector<8x512xf32>
    %190 = vector.extract_strided_slice %189 {offsets = [0, 0], sizes = [8, 128], strides = [1, 1]} : vector<8x512xf32> to vector<8x128xf32>
    %191 = arith.negf %190 : vector<8x128xf32>
    %192 = math.exp %191 : vector<8x128xf32>
    %cst_52 = arith.constant 1.000000e+00 : f32
    %193 = vector.broadcast %cst_52 : f32 to vector<8x128xf32>
    %194 = arith.addf %193, %192 : vector<8x128xf32>
    %195 = arith.divf %193, %194 : vector<8x128xf32>
    %196 = vector.extract_strided_slice %189 {offsets = [0, 128], sizes = [8, 128], strides = [1, 1]} : vector<8x512xf32> to vector<8x128xf32>
    %197 = arith.negf %196 : vector<8x128xf32>
    %198 = math.exp %197 : vector<8x128xf32>
    %cst_53 = arith.constant 1.000000e+00 : f32
    %199 = vector.broadcast %cst_53 : f32 to vector<8x128xf32>
    %200 = arith.addf %199, %198 : vector<8x128xf32>
    %201 = arith.divf %199, %200 : vector<8x128xf32>
    %202 = vector.extract_strided_slice %189 {offsets = [0, 256], sizes = [8, 128], strides = [1, 1]} : vector<8x512xf32> to vector<8x128xf32>
    %203 = math.tanh %202 : vector<8x128xf32>
    %204 = vector.extract_strided_slice %189 {offsets = [0, 384], sizes = [8, 128], strides = [1, 1]} : vector<8x512xf32> to vector<8x128xf32>
    %205 = arith.negf %204 : vector<8x128xf32>
    %206 = math.exp %205 : vector<8x128xf32>
    %cst_54 = arith.constant 1.000000e+00 : f32
    %207 = vector.broadcast %cst_54 : f32 to vector<8x128xf32>
    %208 = arith.addf %207, %206 : vector<8x128xf32>
    %209 = arith.divf %207, %208 : vector<8x128xf32>
    %210 = arith.mulf %201, %178 : vector<8x128xf32>
    %211 = arith.mulf %195, %203 : vector<8x128xf32>
    %212 = arith.addf %210, %211 : vector<8x128xf32>
    %213 = math.tanh %212 : vector<8x128xf32>
    %214 = arith.mulf %209, %213 : vector<8x128xf32>
    %215 = arith.index_cast %184 : i32 to index
    %c0_55 = arith.constant 0 : index
    %216 = vector.load %arg5[%215, %c0_55] : memref<64x128xf32, #tpu.memory_space<vmem>>, vector<8x128xf32>
    tpu.vector_store %arg5[%215, %c0_55], %214 {strides = array<i32>} : memref<64x128xf32, #tpu.memory_space<vmem>>, vector<8x128xf32>,
    %c6_i32 = arith.constant 6 : i32
    %c8_i32_56 = arith.constant 8 : i32
    %217 = arith.muli %c6_i32, %c8_i32_56 : i32
    %218 = tpu.assume_multiple %217, 8 : i32
    %219 = arith.index_cast %218 : i32 to index
    %c0_57 = arith.constant 0 : index
    %220 = vector.load %arg8[%219, %c0_57] : memref<64x512xf32, #tpu.memory_space<vmem>>, vector<8x512xf32>
    %221 = arith.truncf %214 : vector<8x128xf32> to vector<8x128xbf16>
    %cst_58 = arith.constant dense<0.000000e+00> : vector<8x512xf32>
    %222 = tpu.matmul %221, %10, %cst_58 {dimension_numbers = #tpu.dot_dimension_numbers<[1], [0], [0], [1], [0, 0, 1, 1], [], []>} : vector<8x128xbf16>, vector<128x512xbf16>, vector<8x512xf32> -> vector<8x512xf32>
    %223 = arith.addf %220, %222 : vector<8x512xf32>
    %224 = vector.extract_strided_slice %223 {offsets = [0, 0], sizes = [8, 128], strides = [1, 1]} : vector<8x512xf32> to vector<8x128xf32>
    %225 = arith.negf %224 : vector<8x128xf32>
    %226 = math.exp %225 : vector<8x128xf32>
    %cst_59 = arith.constant 1.000000e+00 : f32
    %227 = vector.broadcast %cst_59 : f32 to vector<8x128xf32>
    %228 = arith.addf %227, %226 : vector<8x128xf32>
    %229 = arith.divf %227, %228 : vector<8x128xf32>
    %230 = vector.extract_strided_slice %223 {offsets = [0, 128], sizes = [8, 128], strides = [1, 1]} : vector<8x512xf32> to vector<8x128xf32>
    %231 = arith.negf %230 : vector<8x128xf32>
    %232 = math.exp %231 : vector<8x128xf32>
    %cst_60 = arith.constant 1.000000e+00 : f32
    %233 = vector.broadcast %cst_60 : f32 to vector<8x128xf32>
    %234 = arith.addf %233, %232 : vector<8x128xf32>
    %235 = arith.divf %233, %234 : vector<8x128xf32>
    %236 = vector.extract_strided_slice %223 {offsets = [0, 256], sizes = [8, 128], strides = [1, 1]} : vector<8x512xf32> to vector<8x128xf32>
    %237 = math.tanh %236 : vector<8x128xf32>
    %238 = vector.extract_strided_slice %223 {offsets = [0, 384], sizes = [8, 128], strides = [1, 1]} : vector<8x512xf32> to vector<8x128xf32>
    %239 = arith.negf %238 : vector<8x128xf32>
    %240 = math.exp %239 : vector<8x128xf32>
    %cst_61 = arith.constant 1.000000e+00 : f32
    %241 = vector.broadcast %cst_61 : f32 to vector<8x128xf32>
    %242 = arith.addf %241, %240 : vector<8x128xf32>
    %243 = arith.divf %241, %242 : vector<8x128xf32>
    %244 = arith.mulf %235, %212 : vector<8x128xf32>
    %245 = arith.mulf %229, %237 : vector<8x128xf32>
    %246 = arith.addf %244, %245 : vector<8x128xf32>
    %247 = math.tanh %246 : vector<8x128xf32>
    %248 = arith.mulf %243, %247 : vector<8x128xf32>
    %249 = arith.index_cast %218 : i32 to index
    %c0_62 = arith.constant 0 : index
    %250 = vector.load %arg5[%249, %c0_62] : memref<64x128xf32, #tpu.memory_space<vmem>>, vector<8x128xf32>
    tpu.vector_store %arg5[%249, %c0_62], %248 {strides = array<i32>} : memref<64x128xf32, #tpu.memory_space<vmem>>, vector<8x128xf32>,
    %c7_i32 = arith.constant 7 : i32
    %c8_i32_63 = arith.constant 8 : i32
    %251 = arith.muli %c7_i32, %c8_i32_63 : i32
    %252 = tpu.assume_multiple %251, 8 : i32
    %253 = arith.index_cast %252 : i32 to index
    %c0_64 = arith.constant 0 : index
    %254 = vector.load %arg8[%253, %c0_64] : memref<64x512xf32, #tpu.memory_space<vmem>>, vector<8x512xf32>
    %255 = arith.truncf %248 : vector<8x128xf32> to vector<8x128xbf16>
    %cst_65 = arith.constant dense<0.000000e+00> : vector<8x512xf32>
    %256 = tpu.matmul %255, %10, %cst_65 {dimension_numbers = #tpu.dot_dimension_numbers<[1], [0], [0], [1], [0, 0, 1, 1], [], []>} : vector<8x128xbf16>, vector<128x512xbf16>, vector<8x512xf32> -> vector<8x512xf32>
    %257 = arith.addf %254, %256 : vector<8x512xf32>
    %258 = vector.extract_strided_slice %257 {offsets = [0, 0], sizes = [8, 128], strides = [1, 1]} : vector<8x512xf32> to vector<8x128xf32>
    %259 = arith.negf %258 : vector<8x128xf32>
    %260 = math.exp %259 : vector<8x128xf32>
    %cst_66 = arith.constant 1.000000e+00 : f32
    %261 = vector.broadcast %cst_66 : f32 to vector<8x128xf32>
    %262 = arith.addf %261, %260 : vector<8x128xf32>
    %263 = arith.divf %261, %262 : vector<8x128xf32>
    %264 = vector.extract_strided_slice %257 {offsets = [0, 128], sizes = [8, 128], strides = [1, 1]} : vector<8x512xf32> to vector<8x128xf32>
    %265 = arith.negf %264 : vector<8x128xf32>
    %266 = math.exp %265 : vector<8x128xf32>
    %cst_67 = arith.constant 1.000000e+00 : f32
    %267 = vector.broadcast %cst_67 : f32 to vector<8x128xf32>
    %268 = arith.addf %267, %266 : vector<8x128xf32>
    %269 = arith.divf %267, %268 : vector<8x128xf32>
    %270 = vector.extract_strided_slice %257 {offsets = [0, 256], sizes = [8, 128], strides = [1, 1]} : vector<8x512xf32> to vector<8x128xf32>
    %271 = math.tanh %270 : vector<8x128xf32>
    %272 = vector.extract_strided_slice %257 {offsets = [0, 384], sizes = [8, 128], strides = [1, 1]} : vector<8x512xf32> to vector<8x128xf32>
    %273 = arith.negf %272 : vector<8x128xf32>
    %274 = math.exp %273 : vector<8x128xf32>
    %cst_68 = arith.constant 1.000000e+00 : f32
    %275 = vector.broadcast %cst_68 : f32 to vector<8x128xf32>
    %276 = arith.addf %275, %274 : vector<8x128xf32>
    %277 = arith.divf %275, %276 : vector<8x128xf32>
    %278 = arith.mulf %269, %246 : vector<8x128xf32>
    %279 = arith.mulf %263, %271 : vector<8x128xf32>
    %280 = arith.addf %278, %279 : vector<8x128xf32>
    %281 = math.tanh %280 : vector<8x128xf32>
    %282 = arith.mulf %277, %281 : vector<8x128xf32>
    %283 = arith.index_cast %252 : i32 to index
    %c0_69 = arith.constant 0 : index
    %284 = vector.load %arg5[%283, %c0_69] : memref<64x128xf32, #tpu.memory_space<vmem>>, vector<8x128xf32>
    tpu.vector_store %arg5[%283, %c0_69], %282 {strides = array<i32>} : memref<64x128xf32, #tpu.memory_space<vmem>>, vector<8x128xf32>,
    %c8_i32_70 = arith.constant 8 : i32
    %c0_71 = arith.constant 0 : index
    %c0_72 = arith.constant 0 : index
    %285 = vector.load %arg9[%c0_71, %c0_72] : memref<8x128xf32, #tpu.memory_space<vmem>>, vector<8x128xf32>
    tpu.vector_store %arg9[%c0_71, %c0_72], %282 {strides = array<i32>} : memref<8x128xf32, #tpu.memory_space<vmem>>, vector<8x128xf32>,
    %c0_73 = arith.constant 0 : index
    %c0_74 = arith.constant 0 : index
    %286 = vector.load %arg10[%c0_73, %c0_74] : memref<8x128xf32, #tpu.memory_space<vmem>>, vector<8x128xf32>
    tpu.vector_store %arg10[%c0_73, %c0_74], %280 {strides = array<i32>} : memref<8x128xf32, #tpu.memory_space<vmem>>, vector<8x128xf32>,
    %c0_i32_75 = arith.constant 0 : i32
    %287 = arith.cmpi eq, %arg0, %c0_i32_75 : i32
    %288 = arith.extui %287 : i1 to i32
    %c0_i32_76 = arith.constant 0 : i32
    %289 = arith.cmpi ne, %288, %c0_i32_76 : i32
    scf.if %289 {
      %c0_77 = arith.constant 0 : index
      %c0_78 = arith.constant 0 : index
      %290 = vector.load %arg6[%c0_77, %c0_78] : memref<8x128xf32, #tpu.memory_space<vmem>>, vector<8x128xf32>
      tpu.vector_store %arg6[%c0_77, %c0_78], %282 {strides = array<i32>} : memref<8x128xf32, #tpu.memory_space<vmem>>, vector<8x128xf32>,
      %c0_79 = arith.constant 0 : index
      %c0_80 = arith.constant 0 : index
      %291 = vector.load %arg7[%c0_79, %c0_80] : memref<8x128xf32, #tpu.memory_space<vmem>>, vector<8x128xf32>
      tpu.vector_store %arg7[%c0_79, %c0_80], %280 {strides = array<i32>} : memref<8x128xf32, #tpu.memory_space<vmem>>, vector<8x128xf32>,
    } else {
    }
    return
  }
  func.func @transform_0(%arg0: i32) -> (i32, i32) {
    %c0_i32 = arith.constant 0 : i32
    %c0_i32_0 = arith.constant 0 : i32
    return %arg0, %c0_i32 : i32, i32
  }
  func.func @transform_1(%arg0: i32) -> (i32, i32) {
    %c0_i32 = arith.constant 0 : i32
    %c0_i32_0 = arith.constant 0 : i32
    %c0_i32_1 = arith.constant 0 : i32
    return %c0_i32, %c0_i32_0 : i32, i32
  }
  func.func @transform_2(%arg0: i32) -> (i32, i32) {
    %c0_i32 = arith.constant 0 : i32
    %c0_i32_0 = arith.constant 0 : i32
    %c0_i32_1 = arith.constant 0 : i32
    return %c0_i32, %c0_i32_0 : i32, i32
  }
  func.func @transform_3(%arg0: i32) -> (i32, i32) {
    %c0_i32 = arith.constant 0 : i32
    %c0_i32_0 = arith.constant 0 : i32
    %c0_i32_1 = arith.constant 0 : i32
    return %c0_i32, %c0_i32_0 : i32, i32
  }
  func.func @transform_4(%arg0: i32) -> (i32, i32) {
    %c0_i32 = arith.constant 0 : i32
    %c0_i32_0 = arith.constant 0 : i32
    return %arg0, %c0_i32 : i32, i32
  }
  func.func @transform_5(%arg0: i32) -> (i32, i32) {
    %c0_i32 = arith.constant 0 : i32
    %c0_i32_0 = arith.constant 0 : i32
    %c0_i32_1 = arith.constant 0 : i32
    return %c0_i32, %c0_i32_0 : i32, i32
  }
  func.func @transform_6(%arg0: i32) -> (i32, i32) {
    %c0_i32 = arith.constant 0 : i32
    %c0_i32_0 = arith.constant 0 : i32
    %c0_i32_1 = arith.constant 0 : i32
    return %c0_i32, %c0_i32_0 : i32, i32
  }
}

</mosaic_0001>

<bundles_post_ra>
// kernel: tpu_custom_call.1
= control target key start
LH: loop header
LB: loop body
LE: loop exit
PB: predicated region body
PF: predicated region fallthrough
CT: control target
= control target key end

     0   :  { %12 = vsyncpa [#allocation6], 0  ;;  %s2868_s0 = inlined_call_operand.hbm [shape: bf16[64,128], index: 0, kind: input, shape index: {}]   ;;  %s2869_s1 = inlined_call_operand.hbm [shape: bf16[128,512], index: 1, kind: input, shape index: {}]   ;;  %s2870_s2 = inlined_call_operand.hbm [shape: bf16[128,512], index: 2, kind: input, shape index: {}]   ;;  %s2871_s3 = inlined_call_operand.vmem [shape: f32[1,512], index: 3, kind: input, shape index: {}]   ;;  %s2872_s4 = inlined_call_operand.hbm [shape: f32[64,128], index: 4, kind: output, shape index: {0}]   ;;  %s2873_s5 = inlined_call_operand.hbm [shape: f32[8,128], index: 5, kind: output, shape index: {1}]   ;;  %s2874_s6 = inlined_call_operand.hbm [shape: f32[8,128], index: 6, kind: output, shape index: {2}]  }
   0x1   :  { %13 = vsyncpa [#allocation9], 0 }
   0x2   :  { %14 = vsyncpa [#allocation7], 0 }
   0x3   :  { %15 = vsyncpa [#allocation13], 0  ;;  %s2212_s21 = smov [#allocation8]   ;;  %s2072_s25 = scalar_lea.hbm %s2869_s1, 4096 }
   0x4   :  { %s33_s22 = sshll.u32 %s2212_s21, 4  ;;  %p2073_p0 = scmp.ne.s32.totalorder %s2869_s1, %s2072_s25  ;;  %s34_s22 = int_to_ptr.vmem [resolvable:$true] %s33_s22 }
   0x5   :  { %p2076_p1 = scmp.lt.u32.totalorder %s2072_s25, %s2869_s1 }
   0x7   :  { %p2078_p2 = pnand %p2076_p1, %p2073_p0 }
   0x9   :  { %2081 = shalt.err (!%p2078_p2)
}
   0xa   :  { %s2082_s30 = scalar_lea.vmem %s34_s22, 4096  ;;  %p2087_p4 = scmp.lt.s32.totalorder %s34_s22, %s34_s22 }
   0xb   :  { %p2083_p3 = scmp.ne.s32.totalorder %s34_s22, %s2082_s30  ;;  %p2088_p5 = scmp.lt.s32.totalorder %s2082_s30, %s2082_s30 }
   0xd   :  { %p2089_p6 = por %p2088_p5, %p2087_p4 }
   0xf   :  { %p2090_p7 = pnand %p2089_p6, %p2083_p3 }
  0x11   :  { %2093 = shalt.err (!%p2090_p7)
}
  0x12   :  { %s2213_s7 = smov 256   ;;  %s2214_s8 = smov 16  }
  0x13   :  { %39 = dma.hbm_to_vmem [thread:$0]  %s2869_s1, 4096, %s34_s22, [#allocation9], %s2213_s7, %s2213_s7, %s2214_s8  }
  0x14   :  { %s2215_s11 = smov [#allocation5]   ;;  %s2094_s15 = scalar_lea.hbm %s2868_s0, 512 }
  0x15   :  { %s21_s12 = sshll.u32 %s2215_s11, 4  ;;  %p2095_p8 = scmp.ne.s32.totalorder %s2868_s0, %s2094_s15  ;;  %s22_s12 = int_to_ptr.vmem [resolvable:$true] %s21_s12 }
  0x16   :  { %p2098_p9 = scmp.lt.u32.totalorder %s2094_s15, %s2868_s0 }
  0x18   :  { %p2100_p10 = pnand %p2098_p9, %p2095_p8 }
  0x1a   :  { %2103 = shalt.err (!%p2100_p10)
}
  0x1b   :  { %s2104_s20 = scalar_lea.vmem %s22_s12, 512  ;;  %p2109_p12 = scmp.lt.s32.totalorder %s22_s12, %s22_s12 }
  0x1c   :  { %p2105_p11 = scmp.ne.s32.totalorder %s22_s12, %s2104_s20  ;;  %p2110_p13 = scmp.lt.s32.totalorder %s2104_s20, %s2104_s20 }
  0x1e   :  { %p2111_p0 = por %p2110_p13, %p2109_p12 }
  0x20   :  { %p2112_p1 = pnand %p2111_p0, %p2105_p11 }
  0x22   :  { %2115 = shalt.err (!%p2112_p1)
}
  0x23   :  { %s2216_s1 = smov 64   ;;  %s2217_s21 = smov 4  }
  0x24   :  { %27 = dma.hbm_to_vmem [thread:$0]  %s2868_s0, 512, %s22_s12, [#allocation6], %s2216_s1, %s2216_s1, %s2217_s21  }
  0x25   :  { %s2218_s24 = smov [#allocation10]   ;;  %s2116_s28 = scalar_lea.hbm %s2870_s2, 4096 }
  0x26   :  { %s45_s25 = sshll.u32 %s2218_s24, 4  ;;  %p2117_p2 = scmp.ne.s32.totalorder %s2870_s2, %s2116_s28  ;;  %s46_s25 = int_to_ptr.vmem [resolvable:$true] %s45_s25 }
  0x27   :  { %p2120_p3 = scmp.lt.u32.totalorder %s2116_s28, %s2870_s2 }
  0x29   :  { %p2122_p4 = pnand %p2120_p3, %p2117_p2 }
  0x2b   :  { %2125 = shalt.err (!%p2122_p4)
}
  0x2c   :  { %s2126_s11 = scalar_lea.vmem %s46_s25, 4096  ;;  %p2131_p6 = scmp.lt.s32.totalorder %s46_s25, %s46_s25 }
  0x2d   :  { %p2127_p5 = scmp.ne.s32.totalorder %s46_s25, %s2126_s11  ;;  %p2132_p7 = scmp.lt.s32.totalorder %s2126_s11, %s2126_s11 }
  0x2f   :  { %p2133_p8 = por %p2132_p7, %p2131_p6 }
  0x31   :  { %p2134_p9 = pnand %p2133_p8, %p2127_p5 }
  0x33   :  { %2137 = shalt.err (!%p2134_p9)
}
  0x34   :  { %51 = dma.hbm_to_vmem [thread:$0]  %s2870_s2, 4096, %s46_s25, [#allocation9], %s2213_s7, %s2213_s7, %s2214_s8  }
  0x35   :  { %2204 = dma.done.wait [#allocation6], 512  }
  0x36   :  { %2205 = vsyncadd [#allocation6], 4294966784 }
  0x37   :  { %2206 = dma.done.wait [#allocation9], 8192  }
  0x38   :  { %2207 = vsyncadd [#allocation9], 4294959104  ;;  %v2875_v0 = vmov 0   ;;  %v1812_v1 = vld [vmem:[#allocation8 + $0x4] ss:$16 sps:$4 sm:$0xff]   ;;  %v1873_v44 = vld [vmem:[#allocation5 + $0x8] sm:$0xff]  }
  0x39   :  { %348 = vmatprep.mubr.bf16.mxu0 %v2875_v0  ;;  %421 = vmatprep.mubr.bf16.mxu1 %v2875_v0  ;;  %v1814_v2 = vld [vmem:[#allocation8 + $0xc] ss:$16 sps:$4 sm:$0xff]   ;;  %v1816_v3 = vld [vmem:[#allocation8] ss:$16 sps:$4 sm:$0xff]   ;;  %v1817_v4 = vld [vmem:[#allocation8 + $0x8] ss:$16 sps:$4 sm:$0xff]  }
  0x3a   :  { %316 = vmatprep.subr.bf16.mxu0 %v1812_v1  ;;  %389 = vmatprep.subr.bf16.mxu1 %v1814_v2  ;;  %v1818_v5 = vld [vmem:[#allocation8 + $0x24] ss:$16 sps:$4 sm:$0xff]   ;;  %v1820_v6 = vld [vmem:[#allocation8 + $0x2c] ss:$16 sps:$4 sm:$0xff]   ;;  %v1822_v7 = vld [vmem:[#allocation8 + $0x20] ss:$16 sps:$4 sm:$0xff]  }
  0x3b   :  { %317 = vmatpush1.bf16.msra.mxu0 %v1816_v3  ;;  %390 = vmatpush1.bf16.msra.mxu1 %v1817_v4  ;;  %v1823_v8 = vld [vmem:[#allocation8 + $0x28] ss:$16 sps:$4 sm:$0xff]   ;;  %v1824_v9 = vld [vmem:[#allocation8 + $0x44] ss:$16 sps:$4 sm:$0xff]   ;;  %v1826_v10 = vld [vmem:[#allocation8 + $0x4c] ss:$16 sps:$4 sm:$0xff]  }
  0x3c   :  { %318 = vmatprep.subr.bf16.mxu0 %v1818_v5  ;;  %391 = vmatprep.subr.bf16.mxu1 %v1820_v6  ;;  %v1828_v11 = vld [vmem:[#allocation8 + $0x40] ss:$16 sps:$4 sm:$0xff]   ;;  %v1829_v12 = vld [vmem:[#allocation8 + $0x48] ss:$16 sps:$4 sm:$0xff]   ;;  %v1830_v13 = vld [vmem:[#allocation8 + $0x64] ss:$16 sps:$4 sm:$0xff]  }
  0x3d   :  { %v1832_v14 = vld [vmem:[#allocation8 + $0x6c] ss:$16 sps:$4 sm:$0xff]   ;;  %v1834_v15 = vld [vmem:[#allocation8 + $0x60] ss:$16 sps:$4 sm:$0xff]   ;;  %v1835_v16 = vld [vmem:[#allocation8 + $0x68] ss:$16 sps:$4 sm:$0xff]  }
  0x3e   :  { %v1836_v17 = vld [vmem:[#allocation8 + $0x84] ss:$16 sps:$4 sm:$0xff]   ;;  %v1838_v18 = vld [vmem:[#allocation8 + $0x8c] ss:$16 sps:$4 sm:$0xff]   ;;  %v1840_v19 = vld [vmem:[#allocation8 + $0x80] ss:$16 sps:$4 sm:$0xff]  }
  0x3f   :  { %319 = vmatpush1.bf16.msra.mxu0 %v1822_v7  ;;  %392 = vmatpush1.bf16.msra.mxu1 %v1823_v8  ;;  %v1841_v20 = vld [vmem:[#allocation8 + $0x88] ss:$16 sps:$4 sm:$0xff]   ;;  %v1842_v21 = vld [vmem:[#allocation8 + $0xa4] ss:$16 sps:$4 sm:$0xff]   ;;  %v1844_v22 = vld [vmem:[#allocation8 + $0xac] ss:$16 sps:$4 sm:$0xff]   ;;  %v112_v7 = vlaneseq }
  0x40   :  { %320 = vmatprep.subr.bf16.mxu0 %v1824_v9  ;;  %393 = vmatprep.subr.bf16.mxu1 %v1826_v10  ;;  %v1846_v23 = vld [vmem:[#allocation8 + $0xa0] ss:$16 sps:$4 sm:$0xff]   ;;  %v1847_v24 = vld [vmem:[#allocation8 + $0xa8] ss:$16 sps:$4 sm:$0xff]   ;;  %v1848_v25 = vld [vmem:[#allocation8 + $0xc4] ss:$16 sps:$4 sm:$0xff]  }
  0x41   :  { %v1850_v26 = vld [vmem:[#allocation8 + $0xcc] ss:$16 sps:$4 sm:$0xff]   ;;  %v1852_v27 = vld [vmem:[#allocation8 + $0xc0] ss:$16 sps:$4 sm:$0xff]   ;;  %v1853_v28 = vld [vmem:[#allocation8 + $0xc8] ss:$16 sps:$4 sm:$0xff]  }
  0x42   :  { %v1854_v29 = vld [vmem:[#allocation8 + $0xe4] ss:$16 sps:$4 sm:$0xff]   ;;  %v1856_v30 = vld [vmem:[#allocation8 + $0xec] ss:$16 sps:$4 sm:$0xff]   ;;  %v1858_v31 = vld [vmem:[#allocation8 + $0xe0] ss:$16 sps:$4 sm:$0xff]  }
  0x43   :  { %321 = vmatpush1.bf16.msra.mxu0 %v1828_v11  ;;  %394 = vmatpush1.bf16.msra.mxu1 %v1829_v12  ;;  %v1859_v32 = vld [vmem:[#allocation8 + $0xe8] ss:$16 sps:$4 sm:$0xff]   ;;  %v2305_v33 = vld [vmem:[#allocation10 + $0x4] ss:$16 sps:$4 sm:$0xff]   ;;  %v2307_v34 = vld [vmem:[#allocation10 + $0xc] ss:$16 sps:$4 sm:$0xff]  }
  0x44   :  { %322 = vmatprep.subr.bf16.mxu0 %v1830_v13  ;;  %395 = vmatprep.subr.bf16.mxu1 %v1832_v14  ;;  %v1860_v35 = vld [vmem:[#allocation5] sm:$0xff]   ;;  %v2311_v37 = vld [vmem:[#allocation10 + $0x8] ss:$16 sps:$4 sm:$0xff]   ;;  %v2317_v39 = vld [vmem:[#allocation10 + $0x2c] ss:$16 sps:$4 sm:$0xff]   ;;  %v2220_v6 = vmov 0.0|0.0  }
  0x45   :  { %v2309_v36 = vld [vmem:[#allocation10] ss:$16 sps:$4 sm:$0xff]   ;;  %v2315_v38 = vld [vmem:[#allocation10 + $0x24] ss:$16 sps:$4 sm:$0xff]   ;;  %v2323_v41 = vld [vmem:[#allocation10 + $0x28] ss:$16 sps:$4 sm:$0xff]  }
  0x46   :  { %v2319_v40 = vld [vmem:[#allocation10 + $0x20] ss:$16 sps:$4 sm:$0xff]   ;;  %v2327_v42 = vld [vmem:[#allocation10 + $0x44] ss:$16 sps:$4 sm:$0xff]   ;;  %v2329_v43 = vld [vmem:[#allocation10 + $0x4c] ss:$16 sps:$4 sm:$0xff]  }
  0x47   :  { %323 = vmatpush1.bf16.msra.mxu0 %v1834_v15  ;;  %396 = vmatpush1.bf16.msra.mxu1 %v1835_v16  ;;  %v2333_v45 = vld [vmem:[#allocation10 + $0x40] ss:$16 sps:$4 sm:$0xff]   ;;  %v2335_v46 = vld [vmem:[#allocation10 + $0x48] ss:$16 sps:$4 sm:$0xff]   ;;  %v2339_v47 = vld [vmem:[#allocation10 + $0x64] ss:$16 sps:$4 sm:$0xff]  }
  0x48   :  { %324 = vmatprep.subr.bf16.mxu0 %v1836_v17  ;;  %397 = vmatprep.subr.bf16.mxu1 %v1838_v18  ;;  %v2343_v48 = vld [vmem:[#allocation10 + $0x6c] ss:$16 sps:$4 sm:$0xff]   ;;  %v2345_v49 = vld [vmem:[#allocation10 + $0x60] ss:$16 sps:$4 sm:$0xff]   ;;  %v2347_v50 = vld [vmem:[#allocation10 + $0x68] ss:$16 sps:$4 sm:$0xff]  }
  0x49   :  { %v2351_v51 = vld [vmem:[#allocation10 + $0x84] ss:$16 sps:$4 sm:$0xff]   ;;  %v2355_v52 = vld [vmem:[#allocation10 + $0x8c] ss:$16 sps:$4 sm:$0xff]   ;;  %v2361_v54 = vld [vmem:[#allocation10 + $0x80] ss:$16 sps:$4 sm:$0xff]  }
  0x4a   :  { %v1886_v53 = vld [vmem:[#allocation5 + $0x10] sm:$0xff]   ;;  %v2363_v55 = vld [vmem:[#allocation10 + $0x88] ss:$16 sps:$4 sm:$0xff]   ;;  %v2369_v57 = vld [vmem:[#allocation10 + $0xac] ss:$16 sps:$4 sm:$0xff]   ;;  %v113_v8 = vshrl.u32 %v112_v7, 7 }
  0x4b   :  { %325 = vmatpush1.bf16.msra.mxu0 %v1840_v19  ;;  %398 = vmatpush1.bf16.msra.mxu1 %v1841_v20  ;;  %v2367_v56 = vld [vmem:[#allocation10 + $0xa4] ss:$16 sps:$4 sm:$0xff]   ;;  %v2373_v58 = vld [vmem:[#allocation10 + $0xa0] ss:$16 sps:$4 sm:$0xff]   ;;  %v2375_v59 = vld [vmem:[#allocation10 + $0xa8] ss:$16 sps:$4 sm:$0xff]  }
  0x4c   :  { %326 = vmatprep.subr.bf16.mxu0 %v1842_v21  ;;  %399 = vmatprep.subr.bf16.mxu1 %v1844_v22  ;;  %v2379_v60 = vld [vmem:[#allocation10 + $0xc4] ss:$16 sps:$4 sm:$0xff]   ;;  %v2381_v61 = vld [vmem:[#allocation10 + $0xcc] ss:$16 sps:$4 sm:$0xff]   ;;  %v2387_v63 = vld [vmem:[#allocation10 + $0xc0] ss:$16 sps:$4 sm:$0xff]  }
  0x4d   :  { %v1899_v62 = vld [vmem:[#allocation5 + $0x18] sm:$0xff]   ;;  %v2393_v2 = vld [vmem:[#allocation10 + $0xe4] ss:$16 sps:$4 sm:$0xff]   ;;  %v2399_v4 = vld [vmem:[#allocation10 + $0xe0] ss:$16 sps:$4 sm:$0xff]   ;;  %v122_v9 = vsub.s32 2, %v113_v8 }
  0x4e   :  { %v2389_v1 = vld [vmem:[#allocation10 + $0xc8] ss:$16 sps:$4 sm:$0xff]   ;;  %v2395_v3 = vld [vmem:[#allocation10 + $0xec] ss:$16 sps:$4 sm:$0xff]   ;;  %v126_v10 = vsub.s32 3, %v113_v8  ;;  %v114_v11 = vsub.s32 0, %v113_v8 }
  0x4f   :  { %327 = vmatpush1.bf16.msra.mxu0 %v1846_v23  ;;  %400 = vmatpush1.bf16.msra.mxu1 %v1847_v24  ;;  %v2401_v5 = vld [vmem:[#allocation10 + $0xe8] ss:$16 sps:$4 sm:$0xff]   ;;  %v110_v12 = vld [vmem:[%s2871_s3] sm:$0xf]  ;;  %v118_v13 = vsub.s32 1, %v113_v8  ;;  %s2221_s3 = smov [#allocation12]  }
  0x50   :  { %328 = vmatprep.subr.bf16.mxu0 %v1848_v25  ;;  %401 = vmatprep.subr.bf16.mxu1 %v1850_v26  ;;  %v2448_v14 = vrot.slane %v110_v12, %v122_v9  ;;  %v2454_v17 = vrot.slane %v110_v12, %v126_v10  ;;  %v115_v18 = vrot.slane %v110_v12, %v114_v11  ;;  %s1672_s8 = sshll.u32 %s2221_s3, 4  ;;  %s2222_s13 = smov [#allocation11]   ;;  %s1673_s8 = int_to_ptr.vmem [resolvable:$true] %s1672_s8 }
  0x51   :  { %v119_v21 = vrot.slane %v110_v12, %v118_v13  ;;  %s1659_s14 = sshll.u32 %s2222_s13, 4  ;;  %s2223_s15 = smov [#allocation14]   ;;  %s2818_s14 = int_to_ptr.vmem [resolvable:$true] %s1659_s14 }
  0x52   :  { %s1682_s16 = sshll.u32 %s2223_s15, 4  ;;  %s2138_s17 = scalar_lea.vmem %s1673_s8, 128  ;;  %s2820_s16 = int_to_ptr.vmem [resolvable:$true] %s1682_s16 }
  0x53   :  { %329 = vmatpush1.bf16.msra.mxu0 %v1852_v27  ;;  %402 = vmatpush1.bf16.msra.mxu1 %v1853_v28  ;;  %p2139_p10 = scmp.ne.s32.totalorder %s1673_s8, %s2138_s17  ;;  %p2143_p11 = scmp.lt.s32.totalorder %s1673_s8, %s1673_s8 }
  0x54   :  { %330 = vmatprep.subr.bf16.mxu0 %v1854_v29  ;;  %403 = vmatprep.subr.bf16.mxu1 %v1856_v30  ;;  %p2144_p12 = scmp.lt.s32.totalorder %s2138_s17, %s2138_s17 }
  0x56   :  { %p2145_p13 = por %p2144_p12, %p2143_p11 }
  0x57   :  { %331 = vmatpush1.bf16.msra.mxu0 %v1858_v31  ;;  %404 = vmatpush1.bf16.msra.mxu1 %v1859_v32 }
  0x58   :  { %696 = vmatprep.subr.bf16.mxu0 %v2305_v33  ;;  %737 = vmatprep.subr.bf16.mxu1 %v2307_v34  ;;  %p2146_p0 = pnand %p2145_p13, %p2139_p10 }
  0x5a   :  { %349 = vmatmul.mubr.bf16.vlgmr.msra.gmra.mrb[0].mxu0 %v1860_v35  ;;  %422 = vmatmul.mubr.bf16.vlgmr.msra.gmra.mrb[0].mxu1 %v1860_v35 }
  0x5b   :  { %697 = vmatpush1.bf16.msra.mxu0 %v2309_v36  ;;  %738 = vmatpush1.bf16.msra.mxu1 %v2311_v37 }
  0x5c   :  { %698 = vmatprep.subr.bf16.mxu0 %v2315_v38  ;;  %739 = vmatprep.subr.bf16.mxu1 %v2317_v39 }
  0x5d   :  { %358 = vmatprep.mubr.bf16.mxu0 %v2875_v0  ;;  %431 = vmatprep.mubr.bf16.mxu1 %v2875_v0 }
  0x5f   :  { %699 = vmatpush1.bf16.msra.mxu0 %v2319_v40  ;;  %740 = vmatpush1.bf16.msra.mxu1 %v2323_v41 }
  0x60   :  { %700 = vmatprep.subr.bf16.mxu0 %v2327_v42  ;;  %741 = vmatprep.subr.bf16.mxu1 %v2329_v43 }
  0x62   :  { %359 = vmatmul.mubr.bf16.gmra.mrb[4].mxu0 %v1873_v44  ;;  %432 = vmatmul.mubr.bf16.gmra.mrb[4].mxu1 %v1873_v44 }
  0x63   :  { %701 = vmatpush1.bf16.msra.mxu0 %v2333_v45  ;;  %742 = vmatpush1.bf16.msra.mxu1 %v2335_v46 }
  0x64   :  { %702 = vmatprep.subr.bf16.mxu0 %v2339_v47  ;;  %743 = vmatprep.subr.bf16.mxu1 %v2343_v48 }
  0x65   :  { %368 = vmatprep.mubr.bf16.mxu0 %v2875_v0  ;;  %441 = vmatprep.mubr.bf16.mxu1 %v2875_v0 }
  0x67   :  { %703 = vmatpush1.bf16.msra.mxu0 %v2345_v49  ;;  %744 = vmatpush1.bf16.msra.mxu1 %v2347_v50 }
  0x68   :  { %704 = vmatprep.subr.bf16.mxu0 %v2351_v51  ;;  %745 = vmatprep.subr.bf16.mxu1 %v2355_v52 }
  0x6a   :  { %369 = vmatmul.mubr.bf16.gmra.mrb[8].mxu0 %v1886_v53  ;;  %442 = vmatmul.mubr.bf16.gmra.mrb[8].mxu1 %v1886_v53 }
  0x6b   :  { %705 = vmatpush1.bf16.msra.mxu0 %v2361_v54  ;;  %746 = vmatpush1.bf16.msra.mxu1 %v2363_v55 }
  0x6c   :  { %706 = vmatprep.subr.bf16.mxu0 %v2367_v56  ;;  %747 = vmatprep.subr.bf16.mxu1 %v2369_v57 }
  0x6d   :  { %378 = vmatprep.mubr.bf16.mxu0 %v2875_v0  ;;  %451 = vmatprep.mubr.bf16.mxu1 %v2875_v0 }
  0x6f   :  { %707 = vmatpush1.bf16.msra.mxu0 %v2373_v58  ;;  %748 = vmatpush1.bf16.msra.mxu1 %v2375_v59 }
  0x70   :  { %708 = vmatprep.subr.bf16.mxu0 %v2379_v60  ;;  %749 = vmatprep.subr.bf16.mxu1 %v2381_v61 }
  0x72   :  { %379 = vmatmul.mubr.bf16.gmra.mrb[12].mxu0 %v1899_v62  ;;  %452 = vmatmul.mubr.bf16.gmra.mrb[12].mxu1 %v1899_v62 }
  0x73   :  { %709 = vmatpush1.bf16.msra.mxu0 %v2387_v63  ;;  %750 = vmatpush1.bf16.msra.mxu1 %v2389_v1 }
  0x74   :  { %710 = vmatprep.subr.bf16.mxu0 %v2393_v2  ;;  %751 = vmatprep.subr.bf16.mxu1 %v2395_v3 }
  0x75   :  { %728 = vmatprep.mubr.bf16.mxu0 %v2875_v0  ;;  %769 = vmatprep.mubr.bf16.mxu1 %v2875_v0 }
  0x77   :  { %711 = vmatpush1.bf16.msra.mxu0 %v2399_v4  ;;  %752 = vmatpush1.bf16.msra.mxu1 %v2401_v5 }
  0x78   :  { %815 = vmatprep.subr.bf16.mxu0 %v2305_v33  ;;  %856 = vmatprep.subr.bf16.mxu1 %v2307_v34 }
  0x7a   :  { %729 = vmatmul.mubr.bf16.vlgmr.msra.gmra.mrb[16].mxu0 %v2220_v6  ;;  %770 = vmatmul.mubr.bf16.vlgmr.msra.gmra.mrb[16].mxu1 %v2220_v6 }
  0x7b   :  { %816 = vmatpush1.bf16.msra.mxu0 %v2309_v36  ;;  %857 = vmatpush1.bf16.msra.mxu1 %v2311_v37 }
  0x7c   :  { %817 = vmatprep.subr.bf16.mxu0 %v2315_v38  ;;  %858 = vmatprep.subr.bf16.mxu1 %v2317_v39 }
  0x7d   :  { %847 = vmatprep.mubr.bf16.mxu0 %v2875_v0  ;;  %888 = vmatprep.mubr.bf16.mxu1 %v2875_v0 }
  0x7f   :  { %818 = vmatpush1.bf16.msra.mxu0 %v2319_v40  ;;  %859 = vmatpush1.bf16.msra.mxu1 %v2323_v41 }
  0x80   :  { %819 = vmatprep.subr.bf16.mxu0 %v2327_v42  ;;  %860 = vmatprep.subr.bf16.mxu1 %v2329_v43 }
  0x83   :  { %820 = vmatpush1.bf16.msra.mxu0 %v2333_v45  ;;  %861 = vmatpush1.bf16.msra.mxu1 %v2335_v46 }
  0x84   :  { %821 = vmatprep.subr.bf16.mxu0 %v2339_v47  ;;  %862 = vmatprep.subr.bf16.mxu1 %v2343_v48 }
  0x87   :  { %822 = vmatpush1.bf16.msra.mxu0 %v2345_v49  ;;  %863 = vmatpush1.bf16.msra.mxu1 %v2347_v50 }
  0x88   :  { %823 = vmatprep.subr.bf16.mxu0 %v2351_v51  ;;  %864 = vmatprep.subr.bf16.mxu1 %v2355_v52 }
  0x8b   :  { %824 = vmatpush1.bf16.msra.mxu0 %v2361_v54  ;;  %865 = vmatpush1.bf16.msra.mxu1 %v2363_v55 }
  0x8c   :  { %825 = vmatprep.subr.bf16.mxu0 %v2367_v56  ;;  %866 = vmatprep.subr.bf16.mxu1 %v2369_v57 }
  0x8f   :  { %826 = vmatpush1.bf16.msra.mxu0 %v2373_v58  ;;  %867 = vmatpush1.bf16.msra.mxu1 %v2375_v59 }
  0x90   :  { %827 = vmatprep.subr.bf16.mxu0 %v2379_v60  ;;  %868 = vmatprep.subr.bf16.mxu1 %v2381_v61 }
  0x93   :  { %828 = vmatpush1.bf16.msra.mxu0 %v2387_v63  ;;  %869 = vmatpush1.bf16.msra.mxu1 %v2389_v1 }
  0x94   :  { %829 = vmatprep.subr.bf16.mxu0 %v2393_v2  ;;  %870 = vmatprep.subr.bf16.mxu1 %v2395_v3 }
  0x97   :  { %830 = vmatpush1.bf16.msra.mxu0 %v2399_v4  ;;  %871 = vmatpush1.bf16.msra.mxu1 %v2401_v5 }
  0x98   :  { %935 = vmatprep.subr.bf16.mxu0 %v2305_v33  ;;  %976 = vmatprep.subr.bf16.mxu1 %v2307_v34 }
 0x12d   :  { %v2450_v15 = vpop.f32.mrb[0].mxu0  ;;  %v2452_v16 = vpop.f32.mrb[0].mxu1 }
 0x12e   :  { %v352_v19 = vpop.f32.mrb[1].mxu0  ;;  %v425_v20 = vpop.f32.mrb[1].mxu1 }
 0x12f   :  { %v354_v22 = vpop.f32.mrb[2].mxu0  ;;  %v427_v23 = vpop.f32.mrb[2].mxu1 }
 0x130   :  { %v2456_v24 = vadd.f32 %v354_v22, %v115_v18  ;;  %v356_v25 = vpop.f32.mrb[3].mxu0  ;;  %v2459_v26 = vadd.f32 %v427_v23, %v2448_v14  ;;  %v429_v27 = vpop.f32.mrb[3].mxu1 }
 0x131   :  { %v2461_v28 = vadd.f32 %v356_v25, %v119_v21  ;;  %v2464_v29 = vadd.f32 %v429_v27, %v2454_v17 }
 0x135   :  { %v360_v30 = vpop.f32.mrb[4].mxu0  ;;  %v433_v31 = vpop.f32.mrb[4].mxu1 }
 0x136   :  { %v2466_v32 = vadd.f32 %v360_v30, %v115_v18  ;;  %v362_v35 = vpop.f32.mrb[5].mxu0  ;;  %v2469_v44 = vadd.f32 %v433_v31, %v2448_v14  ;;  %v435_v53 = vpop.f32.mrb[5].mxu1 }
 0x137   :  { %v2471_v62 = vadd.f32 %v362_v35, %v119_v21  ;;  %v364_v6 = vpop.f32.mrb[6].mxu0  ;;  %v2474_v7 = vadd.f32 %v435_v53, %v2454_v17  ;;  %v437_v8 = vpop.f32.mrb[6].mxu1 }
 0x138   :  { %v2476_v9 = vadd.f32 %v364_v6, %v115_v18  ;;  %v366_v10 = vpop.f32.mrb[7].mxu0  ;;  %v2479_v11 = vadd.f32 %v437_v8, %v2448_v14  ;;  %v439_v12 = vpop.f32.mrb[7].mxu1 }
 0x139   :  { %2877 = vst [vmem:[#allocation19_spill] sm:$0xff] %v2474_v7  ;;  %v2481_v13 = vadd.f32 %v366_v10, %v119_v21  ;;  %v2484_v22 = vadd.f32 %v439_v12, %v2454_v17 }
 0x13a   :  { %2878 = vst [vmem:[#allocation20_spill] sm:$0xff] %v2476_v9  ;;  %2879 = vst [vmem:[#allocation21_spill] sm:$0xff] %v2479_v11 }
 0x13b   :  { %2880 = vst [vmem:[#allocation22_spill] sm:$0xff] %v2481_v13  ;;  %2881 = vst [vmem:[#allocation23_spill] sm:$0xff] %v2484_v22 }
 0x13d   :  { %v370_v23 = vpop.f32.mrb[8].mxu0  ;;  %v443_v25 = vpop.f32.mrb[8].mxu1 }
 0x13e   :  { %v2486_v27 = vadd.f32 %v370_v23, %v115_v18  ;;  %v372_v30 = vpop.f32.mrb[9].mxu0  ;;  %v2489_v31 = vadd.f32 %v443_v25, %v2448_v14  ;;  %v445_v35 = vpop.f32.mrb[9].mxu1 }
 0x13f   :  { %v2491_v53 = vadd.f32 %v372_v30, %v119_v21  ;;  %v374_v6 = vpop.f32.mrb[10].mxu0  ;;  %v2494_v8 = vadd.f32 %v445_v35, %v2454_v17  ;;  %v447_v10 = vpop.f32.mrb[10].mxu1 }
 0x140   :  { %2882 = vst [vmem:[#allocation24_spill] sm:$0xff] %v2486_v27  ;;  %2883 = vst [vmem:[#allocation25_spill] sm:$0xff] %v2489_v31  ;;  %v2496_v0 = vadd.f32 %v374_v6, %v115_v18  ;;  %v376_v12 = vpop.f32.mrb[11].mxu0  ;;  %v2499_v22 = vadd.f32 %v447_v10, %v2448_v14  ;;  %v449_v23 = vpop.f32.mrb[11].mxu1 }
 0x141   :  { %2884 = vst [vmem:[#allocation26_spill] sm:$0xff] %v2491_v53  ;;  %2885 = vst [vmem:[#allocation27_spill] sm:$0xff] %v2494_v8  ;;  %v2501_v27 = vadd.f32 %v376_v12, %v119_v21  ;;  %v2504_v25 = vadd.f32 %v449_v23, %v2454_v17 }
 0x142   :  { %2886 = vst [vmem:[#allocation28_spill] sm:$0xff] %v2496_v0  ;;  %2887 = vst [vmem:[#allocation29_spill] sm:$0xff] %v2499_v22 }
 0x143   :  { %2888 = vst [vmem:[#allocation30_spill] sm:$0xff] %v2501_v27  ;;  %2889 = vst [vmem:[#allocation31_spill] sm:$0xff] %v2504_v25 }
 0x145   :  { %v380_v31 = vpop.f32.mrb[12].mxu0  ;;  %v453_v30 = vpop.f32.mrb[12].mxu1 }
 0x146   :  { %v2506_v53 = vadd.f32 %v380_v31, %v115_v18  ;;  %v382_v13 = vpop.f32.mrb[13].mxu0  ;;  %v2509_v35 = vadd.f32 %v453_v30, %v2448_v14  ;;  %v455_v6 = vpop.f32.mrb[13].mxu1 }
 0x147   :  { %v2511_v0 = vadd.f32 %v382_v13, %v119_v21  ;;  %v384_v8 = vpop.f32.mrb[14].mxu0  ;;  %v2514_v10 = vadd.f32 %v455_v6, %v2454_v17  ;;  %v457_v12 = vpop.f32.mrb[14].mxu1  ;;  %v351_v13 = vadd.f32 %v2450_v15, %v115_v18  ;;  %v353_v6 = vadd.f32 %v352_v19, %v119_v21 }
 0x148   :  { %2890 = vst [vmem:[#allocation32_spill] sm:$0xff] %v2506_v53  ;;  %2891 = vst [vmem:[#allocation33_spill] sm:$0xff] %v2509_v35  ;;  %v2516_v27 = vadd.f32 %v384_v8, %v115_v18  ;;  %v386_v23 = vpop.f32.mrb[15].mxu0  ;;  %v2519_v25 = vadd.f32 %v457_v12, %v2448_v14  ;;  %v459_v31 = vpop.f32.mrb[15].mxu1 }
 0x149   :  { %2892 = vst [vmem:[#allocation34_spill] sm:$0xff] %v2511_v0  ;;  %2893 = vst [vmem:[#allocation35_spill] sm:$0xff] %v2514_v10  ;;  %v2521_v53 = vadd.f32 %v386_v23, %v119_v21  ;;  %v2524_v30 = vadd.f32 %v459_v31, %v2454_v17  ;;  %v424_v0 = vadd.f32 %v2452_v16, %v2448_v14 }
 0x14a   :  { %2894 = vst [vmem:[#allocation36_spill] sm:$0xff] %v2516_v27  ;;  %2895 = vst [vmem:[#allocation37_spill] sm:$0xff] %v2519_v25  ;;  %v426_v10 = vadd.f32 %v425_v20, %v2454_v17 }
 0x14b   :  { %2896 = vst [vmem:[#allocation38_spill] sm:$0xff] %v2521_v53  ;;  %2897 = vst [vmem:[#allocation39_spill] sm:$0xff] %v2524_v30 }
 0x14d   :  { %v730_v8 = vpop.f32.mrb[16].mxu0  ;;  %v771_v27 = vpop.f32.mrb[16].mxu1 }
 0x14e   :  { %v778_v35 = vadd.f32 %v730_v8, %v351_v13  ;;  %v780_v22 = vadd.f32 %v771_v27, %v424_v0  ;;  %v732_v12 = vpop.f32.mrb[17].mxu0  ;;  %v773_v25 = vpop.f32.mrb[17].mxu1 }
 0x14f   :  { %v779_v11 = vadd.f32 %v732_v12, %v353_v6  ;;  %v781_v23 = vadd.f32 %v773_v25, %v426_v10  ;;  %v734_v53 = vpop.f32.mrb[18].mxu0  ;;  %v775_v9 = vpop.f32.mrb[18].mxu1 }
 0x150   :  { %v1774_v31 = vmul.f32 -1.442695, %v778_v35  ;;  %v735_v30 = vpop.f32.mrb[19].mxu0  ;;  %v776_v7 = vpop.f32.mrb[19].mxu1 }
 0x151   :  { %v1775_v15 = vmul.f32 -1.442695, %v779_v11  ;;  %v1776_v14 = vmul.f32 -1.442695, %v781_v23  ;;  %v2898_v30 = vmov 0  }
 0x152   :  { %1912 = vpow2.f32 %v1774_v31 }
 0x153   :  { %1914 = vpow2.f32 %v1775_v15 }
 0x154   :  { %1916 = vpow2.f32 %v1776_v14 }
 0x155   :  { %1918 = vtanh.f32 %v780_v22 }
 0x15c   :  { %v1913_v16 = vpop.eup %1912 }
 0x15d   :  { %v1915_v18 = vpop.eup %1914  ;;  %v785_v17 = vadd.f32 1.0, %v1913_v16 }
 0x15e   :  { %v791_v19 = vadd.f32 1.0, %v1915_v18  ;;  %v1917_v0 = vpop.eup %1916 }
 0x15f   :  { %1920 = vrcp.f32 %v785_v17  ;;  %v1919_v20 = vpop.eup %1918  ;;  %v798_v53 = vadd.f32 1.0, %v1917_v0 }
 0x160   :  { %1922 = vrcp.f32 %v791_v19 }
 0x161   :  { %1924 = vrcp.f32 %v798_v53 }
 0x169   :  { %v1921_v21 = vpop.eup %1920 }
 0x16a   :  { %v1923_v27 = vpop.eup %1922  ;;  %v802_v9 = vmul.f32 %v1921_v21, %v1919_v20 }
 0x16b   :  { %v801_v25 = vmul.f32 0.0, %v1923_v27  ;;  %v1925_v11 = vpop.eup %1924 }
 0x16d   :  { %v2530_v7 = vadd.f32 %v802_v9, %v801_v25 }
 0x16f   :  { %1926 = vtanh.f32 %v2530_v7 }
 0x179   :  { %v1927_v35 = vpop.eup %1926 }
 0x17a   :  { %v805_v10 = vmul.f32 %v1927_v35, %v1925_v11 }
 0x17c   :  { %806 = vst [vmem:[#allocation11] sm:$0xff] %v805_v10  ;;  %v814_v22 = vpack.c.bf16 %v805_v10, %v805_v10 }
 0x17e   :  { %848 = vmatmul.mubr.bf16.vlgmr.msra.gmra.mrb[20].mxu0 %v814_v22  ;;  %889 = vmatmul.mubr.bf16.vlgmr.msra.gmra.mrb[20].mxu1 %v814_v22 }
 0x17f   :  { %936 = vmatpush1.bf16.msra.mxu0 %v2309_v36  ;;  %977 = vmatpush1.bf16.msra.mxu1 %v2311_v37 }
 0x180   :  { %937 = vmatprep.subr.bf16.mxu0 %v2315_v38  ;;  %978 = vmatprep.subr.bf16.mxu1 %v2317_v39 }
 0x181   :  { %967 = vmatprep.mubr.bf16.mxu0 %v2898_v30  ;;  %1008 = vmatprep.mubr.bf16.mxu1 %v2898_v30 }
 0x183   :  { %938 = vmatpush1.bf16.msra.mxu0 %v2319_v40  ;;  %979 = vmatpush1.bf16.msra.mxu1 %v2323_v41 }
 0x184   :  { %939 = vmatprep.subr.bf16.mxu0 %v2327_v42  ;;  %980 = vmatprep.subr.bf16.mxu1 %v2329_v43 }
 0x187   :  { %940 = vmatpush1.bf16.msra.mxu0 %v2333_v45  ;;  %981 = vmatpush1.bf16.msra.mxu1 %v2335_v46 }
 0x188   :  { %941 = vmatprep.subr.bf16.mxu0 %v2339_v47  ;;  %982 = vmatprep.subr.bf16.mxu1 %v2343_v48 }
 0x18b   :  { %942 = vmatpush1.bf16.msra.mxu0 %v2345_v49  ;;  %983 = vmatpush1.bf16.msra.mxu1 %v2347_v50 }
 0x18c   :  { %943 = vmatprep.subr.bf16.mxu0 %v2351_v51  ;;  %984 = vmatprep.subr.bf16.mxu1 %v2355_v52 }
 0x18f   :  { %944 = vmatpush1.bf16.msra.mxu0 %v2361_v54  ;;  %985 = vmatpush1.bf16.msra.mxu1 %v2363_v55 }
 0x190   :  { %945 = vmatprep.subr.bf16.mxu0 %v2367_v56  ;;  %986 = vmatprep.subr.bf16.mxu1 %v2369_v57 }
 0x193   :  { %946 = vmatpush1.bf16.msra.mxu0 %v2373_v58  ;;  %987 = vmatpush1.bf16.msra.mxu1 %v2375_v59 }
 0x194   :  { %947 = vmatprep.subr.bf16.mxu0 %v2379_v60  ;;  %988 = vmatprep.subr.bf16.mxu1 %v2381_v61 }
 0x197   :  { %948 = vmatpush1.bf16.msra.mxu0 %v2387_v63  ;;  %989 = vmatpush1.bf16.msra.mxu1 %v2389_v1 }
 0x198   :  { %949 = vmatprep.subr.bf16.mxu0 %v2393_v2  ;;  %990 = vmatprep.subr.bf16.mxu1 %v2395_v3 }
 0x19b   :  { %950 = vmatpush1.bf16.msra.mxu0 %v2399_v4  ;;  %991 = vmatpush1.bf16.msra.mxu1 %v2401_v5 }
 0x19c   :  { %1055 = vmatprep.subr.bf16.mxu0 %v2305_v33  ;;  %1096 = vmatprep.subr.bf16.mxu1 %v2307_v34 }
 0x251   :  { %v849_v13 = vpop.f32.mrb[20].mxu0  ;;  %v890_v6 = vpop.f32.mrb[20].mxu1 }
 0x252   :  { %v897_v8 = vadd.f32 %v849_v13, %v2456_v24  ;;  %v899_v12 = vadd.f32 %v890_v6, %v2459_v26  ;;  %v851_v23 = vpop.f32.mrb[21].mxu0  ;;  %v892_v31 = vpop.f32.mrb[21].mxu1 }
 0x253   :  { %v898_v15 = vadd.f32 %v851_v23, %v2461_v28  ;;  %v900_v14 = vadd.f32 %v892_v31, %v2464_v29  ;;  %v853_v16 = vpop.f32.mrb[22].mxu0  ;;  %v894_v18 = vpop.f32.mrb[22].mxu1 }
 0x254   :  { %v1777_v17 = vmul.f32 -1.442695, %v897_v8  ;;  %v854_v19 = vpop.f32.mrb[23].mxu0  ;;  %v895_v0 = vpop.f32.mrb[23].mxu1 }
 0x255   :  { %v1778_v20 = vmul.f32 -1.442695, %v898_v15  ;;  %v1779_v21 = vmul.f32 -1.442695, %v900_v14 }
 0x256   :  { %1928 = vpow2.f32 %v1777_v17  ;;  %v2899_v17 = vld [vmem:[#allocation19_spill] sm:$0xff] }
 0x257   :  { %1930 = vpow2.f32 %v1778_v20 }
 0x258   :  { %1932 = vpow2.f32 %v1779_v21 }
 0x259   :  { %1934 = vtanh.f32 %v899_v12 }
 0x260   :  { %v1929_v27 = vpop.eup %1928 }
 0x261   :  { %v1931_v9 = vpop.eup %1930  ;;  %v904_v24 = vadd.f32 1.0, %v1929_v27 }
 0x262   :  { %v910_v26 = vadd.f32 1.0, %v1931_v9  ;;  %v1933_v28 = vpop.eup %1932 }
 0x263   :  { %1936 = vrcp.f32 %v904_v24  ;;  %v1935_v53 = vpop.eup %1934  ;;  %v917_v35 = vadd.f32 1.0, %v1933_v28 }
 0x264   :  { %1938 = vrcp.f32 %v910_v26 }
 0x265   :  { %1940 = vrcp.f32 %v917_v35 }
 0x26d   :  { %v1937_v29 = vpop.eup %1936 }
 0x26e   :  { %v1939_v25 = vpop.eup %1938  ;;  %v921_v11 = vmul.f32 %v1937_v29, %v1935_v53 }
 0x26f   :  { %v920_v10 = vmul.f32 %v1939_v25, %v2530_v7  ;;  %v1941_v13 = vpop.eup %1940 }
 0x271   :  { %v2572_v22 = vadd.f32 %v921_v11, %v920_v10 }
 0x273   :  { %1942 = vtanh.f32 %v2572_v22 }
 0x27d   :  { %v1943_v6 = vpop.eup %1942 }
 0x27e   :  { %v924_v8 = vmul.f32 %v1943_v6, %v1941_v13 }
 0x280   :  { %926 = vst [vmem:[#allocation11 + $0x8] sm:$0xff] %v924_v8  ;;  %v934_v12 = vpack.c.bf16 %v924_v8, %v924_v8 }
 0x282   :  { %968 = vmatmul.mubr.bf16.vlgmr.msra.gmra.mrb[24].mxu0 %v934_v12  ;;  %1009 = vmatmul.mubr.bf16.vlgmr.msra.gmra.mrb[24].mxu1 %v934_v12 }
 0x283   :  { %1056 = vmatpush1.bf16.msra.mxu0 %v2309_v36  ;;  %1097 = vmatpush1.bf16.msra.mxu1 %v2311_v37 }
 0x284   :  { %1057 = vmatprep.subr.bf16.mxu0 %v2315_v38  ;;  %1098 = vmatprep.subr.bf16.mxu1 %v2317_v39 }
 0x285   :  { %1087 = vmatprep.mubr.bf16.mxu0 %v2898_v30  ;;  %1128 = vmatprep.mubr.bf16.mxu1 %v2898_v30 }
 0x287   :  { %1058 = vmatpush1.bf16.msra.mxu0 %v2319_v40  ;;  %1099 = vmatpush1.bf16.msra.mxu1 %v2323_v41 }
 0x288   :  { %1059 = vmatprep.subr.bf16.mxu0 %v2327_v42  ;;  %1100 = vmatprep.subr.bf16.mxu1 %v2329_v43 }
 0x28b   :  { %1060 = vmatpush1.bf16.msra.mxu0 %v2333_v45  ;;  %1101 = vmatpush1.bf16.msra.mxu1 %v2335_v46 }
 0x28c   :  { %1061 = vmatprep.subr.bf16.mxu0 %v2339_v47  ;;  %1102 = vmatprep.subr.bf16.mxu1 %v2343_v48 }
 0x28f   :  { %1062 = vmatpush1.bf16.msra.mxu0 %v2345_v49  ;;  %1103 = vmatpush1.bf16.msra.mxu1 %v2347_v50 }
 0x290   :  { %1063 = vmatprep.subr.bf16.mxu0 %v2351_v51  ;;  %1104 = vmatprep.subr.bf16.mxu1 %v2355_v52 }
 0x293   :  { %1064 = vmatpush1.bf16.msra.mxu0 %v2361_v54  ;;  %1105 = vmatpush1.bf16.msra.mxu1 %v2363_v55 }
 0x294   :  { %1065 = vmatprep.subr.bf16.mxu0 %v2367_v56  ;;  %1106 = vmatprep.subr.bf16.mxu1 %v2369_v57 }
 0x297   :  { %1066 = vmatpush1.bf16.msra.mxu0 %v2373_v58  ;;  %1107 = vmatpush1.bf16.msra.mxu1 %v2375_v59 }
 0x298   :  { %1067 = vmatprep.subr.bf16.mxu0 %v2379_v60  ;;  %1108 = vmatprep.subr.bf16.mxu1 %v2381_v61 }
 0x29b   :  { %1068 = vmatpush1.bf16.msra.mxu0 %v2387_v63  ;;  %1109 = vmatpush1.bf16.msra.mxu1 %v2389_v1 }
 0x29c   :  { %1069 = vmatprep.subr.bf16.mxu0 %v2393_v2  ;;  %1110 = vmatprep.subr.bf16.mxu1 %v2395_v3 }
 0x29f   :  { %1070 = vmatpush1.bf16.msra.mxu0 %v2399_v4  ;;  %1111 = vmatpush1.bf16.msra.mxu1 %v2401_v5 }
 0x2a0   :  { %1175 = vmatprep.subr.bf16.mxu0 %v2305_v33  ;;  %1216 = vmatprep.subr.bf16.mxu1 %v2307_v34 }
 0x355   :  { %v969_v7 = vpop.f32.mrb[24].mxu0  ;;  %v1010_v23 = vpop.f32.mrb[24].mxu1 }
 0x356   :  { %v1017_v31 = vadd.f32 %v969_v7, %v2466_v32  ;;  %v1019_v15 = vadd.f32 %v1010_v23, %v2469_v44  ;;  %v971_v14 = vpop.f32.mrb[25].mxu0  ;;  %v1012_v16 = vpop.f32.mrb[25].mxu1 }
 0x357   :  { %v1018_v18 = vadd.f32 %v971_v14, %v2471_v62  ;;  %v1020_v19 = vadd.f32 %v1012_v16, %v2899_v17  ;;  %v973_v0 = vpop.f32.mrb[26].mxu0  ;;  %v1014_v20 = vpop.f32.mrb[26].mxu1  ;;  %v2901_v16 = vld [vmem:[#allocation21_spill] sm:$0xff] }
 0x358   :  { %v1780_v21 = vmul.f32 -1.442695, %v1017_v31  ;;  %v974_v27 = vpop.f32.mrb[27].mxu0  ;;  %v1015_v9 = vpop.f32.mrb[27].mxu1  ;;  %v2902_v0 = vld [vmem:[#allocation22_spill] sm:$0xff] }
 0x359   :  { %v1781_v24 = vmul.f32 -1.442695, %v1018_v18  ;;  %v1782_v26 = vmul.f32 -1.442695, %v1020_v19 }
 0x35a   :  { %1944 = vpow2.f32 %v1780_v21  ;;  %v2903_v21 = vld [vmem:[#allocation23_spill] sm:$0xff] }
 0x35b   :  { %1946 = vpow2.f32 %v1781_v24 }
 0x35c   :  { %1948 = vpow2.f32 %v1782_v26 }
 0x35d   :  { %1950 = vtanh.f32 %v1019_v15  ;;  %v2900_v15 = vld [vmem:[#allocation20_spill] sm:$0xff] }
 0x364   :  { %v1945_v28 = vpop.eup %1944 }
 0x365   :  { %v1947_v53 = vpop.eup %1946  ;;  %v1024_v32 = vadd.f32 1.0, %v1945_v28 }
 0x366   :  { %v1030_v44 = vadd.f32 1.0, %v1947_v53  ;;  %v1949_v62 = vpop.eup %1948 }
 0x367   :  { %1952 = vrcp.f32 %v1024_v32  ;;  %v1951_v29 = vpop.eup %1950  ;;  %v1037_v10 = vadd.f32 1.0, %v1949_v62 }
 0x368   :  { %1954 = vrcp.f32 %v1030_v44 }
 0x369   :  { %1956 = vrcp.f32 %v1037_v10 }
 0x371   :  { %v1953_v25 = vpop.eup %1952 }
 0x372   :  { %v1955_v11 = vpop.eup %1954  ;;  %v1041_v35 = vmul.f32 %v1953_v25, %v1951_v29 }
 0x373   :  { %v1040_v13 = vmul.f32 %v1955_v11, %v2572_v22  ;;  %v1957_v8 = vpop.eup %1956 }
 0x375   :  { %v2614_v6 = vadd.f32 %v1041_v35, %v1040_v13 }
 0x377   :  { %1958 = vtanh.f32 %v2614_v6 }
 0x381   :  { %v1959_v12 = vpop.eup %1958 }
 0x382   :  { %v1044_v7 = vmul.f32 %v1959_v12, %v1957_v8 }
 0x384   :  { %1046 = vst [vmem:[#allocation11 + $0x10] sm:$0xff] %v1044_v7  ;;  %v1054_v23 = vpack.c.bf16 %v1044_v7, %v1044_v7 }
 0x386   :  { %1088 = vmatmul.mubr.bf16.vlgmr.msra.gmra.mrb[28].mxu0 %v1054_v23  ;;  %1129 = vmatmul.mubr.bf16.vlgmr.msra.gmra.mrb[28].mxu1 %v1054_v23 }
 0x387   :  { %1176 = vmatpush1.bf16.msra.mxu0 %v2309_v36  ;;  %1217 = vmatpush1.bf16.msra.mxu1 %v2311_v37 }
 0x388   :  { %1177 = vmatprep.subr.bf16.mxu0 %v2315_v38  ;;  %1218 = vmatprep.subr.bf16.mxu1 %v2317_v39 }
 0x389   :  { %1207 = vmatprep.mubr.bf16.mxu0 %v2898_v30  ;;  %1248 = vmatprep.mubr.bf16.mxu1 %v2898_v30 }
 0x38b   :  { %1178 = vmatpush1.bf16.msra.mxu0 %v2319_v40  ;;  %1219 = vmatpush1.bf16.msra.mxu1 %v2323_v41 }
 0x38c   :  { %1179 = vmatprep.subr.bf16.mxu0 %v2327_v42  ;;  %1220 = vmatprep.subr.bf16.mxu1 %v2329_v43 }
 0x38f   :  { %1180 = vmatpush1.bf16.msra.mxu0 %v2333_v45  ;;  %1221 = vmatpush1.bf16.msra.mxu1 %v2335_v46 }
 0x390   :  { %1181 = vmatprep.subr.bf16.mxu0 %v2339_v47  ;;  %1222 = vmatprep.subr.bf16.mxu1 %v2343_v48 }
 0x393   :  { %1182 = vmatpush1.bf16.msra.mxu0 %v2345_v49  ;;  %1223 = vmatpush1.bf16.msra.mxu1 %v2347_v50 }
 0x394   :  { %1183 = vmatprep.subr.bf16.mxu0 %v2351_v51  ;;  %1224 = vmatprep.subr.bf16.mxu1 %v2355_v52 }
 0x397   :  { %1184 = vmatpush1.bf16.msra.mxu0 %v2361_v54  ;;  %1225 = vmatpush1.bf16.msra.mxu1 %v2363_v55 }
 0x398   :  { %1185 = vmatprep.subr.bf16.mxu0 %v2367_v56  ;;  %1226 = vmatprep.subr.bf16.mxu1 %v2369_v57 }
 0x39b   :  { %1186 = vmatpush1.bf16.msra.mxu0 %v2373_v58  ;;  %1227 = vmatpush1.bf16.msra.mxu1 %v2375_v59 }
 0x39c   :  { %1187 = vmatprep.subr.bf16.mxu0 %v2379_v60  ;;  %1228 = vmatprep.subr.bf16.mxu1 %v2381_v61 }
 0x39f   :  { %1188 = vmatpush1.bf16.msra.mxu0 %v2387_v63  ;;  %1229 = vmatpush1.bf16.msra.mxu1 %v2389_v1 }
 0x3a0   :  { %1189 = vmatprep.subr.bf16.mxu0 %v2393_v2  ;;  %1230 = vmatprep.subr.bf16.mxu1 %v2395_v3 }
 0x3a3   :  { %1190 = vmatpush1.bf16.msra.mxu0 %v2399_v4  ;;  %1231 = vmatpush1.bf16.msra.mxu1 %v2401_v5 }
 0x3a4   :  { %1295 = vmatprep.subr.bf16.mxu0 %v2305_v33  ;;  %1336 = vmatprep.subr.bf16.mxu1 %v2307_v34 }
 0x459   :  { %v1089_v22 = vpop.f32.mrb[28].mxu0  ;;  %v1130_v31 = vpop.f32.mrb[28].mxu1 }
 0x45a   :  { %v1137_v14 = vadd.f32 %v1089_v22, %v2900_v15  ;;  %v1139_v18 = vadd.f32 %v1130_v31, %v2901_v16  ;;  %v1091_v17 = vpop.f32.mrb[29].mxu0  ;;  %v1132_v19 = vpop.f32.mrb[29].mxu1 }
 0x45b   :  { %v1138_v20 = vadd.f32 %v1091_v17, %v2902_v0  ;;  %v1140_v27 = vadd.f32 %v1132_v19, %v2903_v21  ;;  %v1093_v9 = vpop.f32.mrb[30].mxu0  ;;  %v1134_v24 = vpop.f32.mrb[30].mxu1 }
 0x45c   :  { %v1783_v26 = vmul.f32 -1.442695, %v1137_v14  ;;  %v1094_v28 = vpop.f32.mrb[31].mxu0  ;;  %v1135_v53 = vpop.f32.mrb[31].mxu1 }
 0x45d   :  { %v1784_v33 = vmul.f32 -1.442695, %v1138_v20  ;;  %v1785_v34 = vmul.f32 -1.442695, %v1140_v27 }
 0x45e   :  { %1960 = vpow2.f32 %v1783_v26 }
 0x45f   :  { %1962 = vpow2.f32 %v1784_v33 }
 0x460   :  { %1964 = vpow2.f32 %v1785_v34 }
 0x461   :  { %1966 = vtanh.f32 %v1139_v18 }
 0x468   :  { %v1961_v32 = vpop.eup %1960 }
 0x469   :  { %v1963_v44 = vpop.eup %1962  ;;  %v1144_v62 = vadd.f32 1.0, %v1961_v32  ;;  %v2705_v32 = vld [vmem:[#allocation10] ss:$16 sps:$4 sm:$0xff]  }
 0x46a   :  { %v1150_v29 = vadd.f32 1.0, %v1963_v44  ;;  %v1965_v25 = vpop.eup %1964  ;;  %v2708_v44 = vld [vmem:[#allocation10 + $0x8] ss:$16 sps:$4 sm:$0xff]  }
 0x46b   :  { %1968 = vrcp.f32 %v1144_v62  ;;  %v1967_v11 = vpop.eup %1966  ;;  %v1157_v8 = vadd.f32 1.0, %v1965_v25  ;;  %v2711_v62 = vld [vmem:[#allocation10 + $0x24] ss:$16 sps:$4 sm:$0xff]   ;;  %v2719_v25 = vld [vmem:[#allocation10 + $0x20] ss:$16 sps:$4 sm:$0xff]  }
 0x46c   :  { %1970 = vrcp.f32 %v1150_v29  ;;  %v2714_v29 = vld [vmem:[#allocation10 + $0x2c] ss:$16 sps:$4 sm:$0xff]  }
 0x46d   :  { %1972 = vrcp.f32 %v1157_v8  ;;  %v2734_v8 = vld [vmem:[#allocation10 + $0x48] ss:$16 sps:$4 sm:$0xff]  }
 0x475   :  { %v1969_v35 = vpop.eup %1968 }
 0x476   :  { %v1971_v10 = vpop.eup %1970  ;;  %v1161_v13 = vmul.f32 %v1969_v35, %v1967_v11  ;;  %v2722_v11 = vld [vmem:[#allocation10 + $0x28] ss:$16 sps:$4 sm:$0xff]   ;;  %v2725_v35 = vld [vmem:[#allocation10 + $0x44] ss:$16 sps:$4 sm:$0xff]  }
 0x477   :  { %v1160_v12 = vmul.f32 %v1971_v10, %v2614_v6  ;;  %v1973_v23 = vpop.eup %1972  ;;  %v2728_v10 = vld [vmem:[#allocation10 + $0x4c] ss:$16 sps:$4 sm:$0xff]  }
 0x479   :  { %v2656_v7 = vadd.f32 %v1161_v13, %v1160_v12  ;;  %v2731_v13 = vld [vmem:[#allocation10 + $0x40] ss:$16 sps:$4 sm:$0xff]   ;;  %v2737_v12 = vld [vmem:[#allocation10 + $0x64] ss:$16 sps:$4 sm:$0xff]  }
 0x47b   :  { %1974 = vtanh.f32 %v2656_v7 }
 0x485   :  { %v1975_v22 = vpop.eup %1974 }
 0x486   :  { %v1164_v31 = vmul.f32 %v1975_v22, %v1973_v23  ;;  %v2743_v23 = vld [vmem:[#allocation10 + $0x60] ss:$16 sps:$4 sm:$0xff]   ;;  %v2746_v22 = vld [vmem:[#allocation10 + $0x68] ss:$16 sps:$4 sm:$0xff]  }
 0x488   :  { %1166 = vst [vmem:[#allocation11 + $0x18] sm:$0xff] %v1164_v31  ;;  %v1174_v15 = vpack.c.bf16 %v1164_v31, %v1164_v31  ;;  %v2749_v31 = vld [vmem:[#allocation10 + $0x84] ss:$16 sps:$4 sm:$0xff]  }
 0x48a   :  { %1208 = vmatmul.mubr.bf16.vlgmr.msra.gmra.mrb[32].mxu0 %v1174_v15  ;;  %1249 = vmatmul.mubr.bf16.vlgmr.msra.gmra.mrb[32].mxu1 %v1174_v15  ;;  %v2752_v15 = vld [vmem:[#allocation10 + $0x8c] ss:$16 sps:$4 sm:$0xff]  }
 0x48b   :  { %1296 = vmatpush1.bf16.msra.mxu0 %v2309_v36  ;;  %1337 = vmatpush1.bf16.msra.mxu1 %v2311_v37  ;;  %v2691_v36 = vld [vmem:[#allocation10 + $0x4] ss:$16 sps:$4 sm:$0xff]   ;;  %v2694_v37 = vld [vmem:[#allocation10 + $0xc] ss:$16 sps:$4 sm:$0xff]  }
 0x48c   :  { %1297 = vmatprep.subr.bf16.mxu0 %v2315_v38  ;;  %1338 = vmatprep.subr.bf16.mxu1 %v2317_v39 }
 0x48d   :  { %1327 = vmatprep.mubr.bf16.mxu0 %v2898_v30  ;;  %1368 = vmatprep.mubr.bf16.mxu1 %v2898_v30 }
 0x48f   :  { %1298 = vmatpush1.bf16.msra.mxu0 %v2319_v40  ;;  %1339 = vmatpush1.bf16.msra.mxu1 %v2323_v41  ;;  %v2904_v40 = vld [vmem:[#allocation24_spill] sm:$0xff] }
 0x490   :  { %1299 = vmatprep.subr.bf16.mxu0 %v2327_v42  ;;  %1340 = vmatprep.subr.bf16.mxu1 %v2329_v43  ;;  %v2905_v42 = vld [vmem:[#allocation25_spill] sm:$0xff] }
 0x493   :  { %1300 = vmatpush1.bf16.msra.mxu0 %v2333_v45  ;;  %1341 = vmatpush1.bf16.msra.mxu1 %v2335_v46 }
 0x494   :  { %1301 = vmatprep.subr.bf16.mxu0 %v2339_v47  ;;  %1342 = vmatprep.subr.bf16.mxu1 %v2343_v48  ;;  %v2906_v47 = vld [vmem:[#allocation26_spill] sm:$0xff] }
 0x497   :  { %1302 = vmatpush1.bf16.msra.mxu0 %v2345_v49  ;;  %1343 = vmatpush1.bf16.msra.mxu1 %v2347_v50  ;;  %v2907_v49 = vld [vmem:[#allocation27_spill] sm:$0xff] }
 0x498   :  { %1303 = vmatprep.subr.bf16.mxu0 %v2351_v51  ;;  %1344 = vmatprep.subr.bf16.mxu1 %v2355_v52 }
 0x49b   :  { %1304 = vmatpush1.bf16.msra.mxu0 %v2361_v54  ;;  %1345 = vmatpush1.bf16.msra.mxu1 %v2363_v55 }
 0x49c   :  { %1305 = vmatprep.subr.bf16.mxu0 %v2367_v56  ;;  %1346 = vmatprep.subr.bf16.mxu1 %v2369_v57 }
 0x49f   :  { %1306 = vmatpush1.bf16.msra.mxu0 %v2373_v58  ;;  %1347 = vmatpush1.bf16.msra.mxu1 %v2375_v59 }
 0x4a0   :  { %1307 = vmatprep.subr.bf16.mxu0 %v2379_v60  ;;  %1348 = vmatprep.subr.bf16.mxu1 %v2381_v61 }
 0x4a3   :  { %1308 = vmatpush1.bf16.msra.mxu0 %v2387_v63  ;;  %1349 = vmatpush1.bf16.msra.mxu1 %v2389_v1 }
 0x4a4   :  { %1309 = vmatprep.subr.bf16.mxu0 %v2393_v2  ;;  %1350 = vmatprep.subr.bf16.mxu1 %v2395_v3 }
 0x4a7   :  { %1310 = vmatpush1.bf16.msra.mxu0 %v2399_v4  ;;  %1351 = vmatpush1.bf16.msra.mxu1 %v2401_v5 }
 0x4a8   :  { %1415 = vmatprep.subr.bf16.mxu0 %v2691_v36  ;;  %1456 = vmatprep.subr.bf16.mxu1 %v2694_v37 }
 0x55d   :  { %v1209_v38 = vpop.f32.mrb[32].mxu0  ;;  %v1250_v39 = vpop.f32.mrb[32].mxu1 }
 0x55e   :  { %v1257_v41 = vadd.f32 %v1209_v38, %v2904_v40  ;;  %v1259_v43 = vadd.f32 %v1250_v39, %v2905_v42  ;;  %v1211_v45 = vpop.f32.mrb[33].mxu0  ;;  %v1252_v46 = vpop.f32.mrb[33].mxu1  ;;  %v2755_v38 = vld [vmem:[#allocation10 + $0x80] ss:$16 sps:$4 sm:$0xff]   ;;  %v2758_v39 = vld [vmem:[#allocation10 + $0x88] ss:$16 sps:$4 sm:$0xff]  }
 0x55f   :  { %v1258_v48 = vadd.f32 %v1211_v45, %v2906_v47  ;;  %v1260_v50 = vadd.f32 %v1252_v46, %v2907_v49  ;;  %v1213_v51 = vpop.f32.mrb[34].mxu0  ;;  %v1254_v52 = vpop.f32.mrb[34].mxu1  ;;  %v2761_v40 = vld [vmem:[#allocation10 + $0xa4] ss:$16 sps:$4 sm:$0xff]   ;;  %v2910_v45 = vld [vmem:[#allocation30_spill] sm:$0xff] }
 0x560   :  { %v1786_v54 = vmul.f32 -1.442695, %v1257_v41  ;;  %v1214_v55 = vpop.f32.mrb[35].mxu0  ;;  %v1255_v56 = vpop.f32.mrb[35].mxu1  ;;  %v2764_v41 = vld [vmem:[#allocation10 + $0xac] ss:$16 sps:$4 sm:$0xff]  }
 0x561   :  { %v1787_v57 = vmul.f32 -1.442695, %v1258_v48  ;;  %v1788_v6 = vmul.f32 -1.442695, %v1260_v50  ;;  %v2909_v42 = vld [vmem:[#allocation29_spill] sm:$0xff]  ;;  %v2911_v46 = vld [vmem:[#allocation31_spill] sm:$0xff] }
 0x562   :  { %1976 = vpow2.f32 %v1786_v54 }
 0x563   :  { %1978 = vpow2.f32 %v1787_v57 }
 0x564   :  { %1980 = vpow2.f32 %v1788_v6 }
 0x565   :  { %1982 = vtanh.f32 %v1259_v43 }
 0x56c   :  { %v1977_v14 = vpop.eup %1976 }
 0x56d   :  { %v1979_v16 = vpop.eup %1978  ;;  %v1264_v18 = vadd.f32 1.0, %v1977_v14 }
 0x56e   :  { %v1270_v17 = vadd.f32 1.0, %v1979_v16  ;;  %v1981_v19 = vpop.eup %1980 }
 0x56f   :  { %1984 = vrcp.f32 %v1264_v18  ;;  %v1983_v0 = vpop.eup %1982  ;;  %v1277_v9 = vadd.f32 1.0, %v1981_v19 }
 0x570   :  { %1986 = vrcp.f32 %v1270_v17 }
 0x571   :  { %1988 = vrcp.f32 %v1277_v9  ;;  %v2064_v9 = vld [vmem:[#allocation10 + $0xc4] ss:$16 sps:$4 sm:$0xff]  }
 0x579   :  { %v1985_v20 = vpop.eup %1984 }
 0x57a   :  { %v1987_v21 = vpop.eup %1986  ;;  %v1281_v27 = vmul.f32 %v1985_v20, %v1983_v0 }
 0x57b   :  { %v1280_v24 = vmul.f32 %v1987_v21, %v2656_v7  ;;  %v1989_v28 = vpop.eup %1988  ;;  %v2740_v7 = vld [vmem:[#allocation10 + $0x6c] ss:$16 sps:$4 sm:$0xff]  }
 0x57d   :  { %v2702_v26 = vadd.f32 %v1281_v27, %v1280_v24  ;;  %v2063_v27 = vld [vmem:[#allocation10 + $0xa8] ss:$16 sps:$4 sm:$0xff]   ;;  %v2065_v24 = vld [vmem:[#allocation10 + $0xcc] ss:$16 sps:$4 sm:$0xff]  }
 0x57f   :  { %1990 = vtanh.f32 %v2702_v26 }
 0x589   :  { %v1991_v53 = vpop.eup %1990 }
 0x58a   :  { %v1284_v33 = vmul.f32 %v1991_v53, %v1989_v28  ;;  %v2067_v28 = vld [vmem:[#allocation10 + $0xc8] ss:$16 sps:$4 sm:$0xff]   ;;  %v2068_v53 = vld [vmem:[#allocation10 + $0xe4] ss:$16 sps:$4 sm:$0xff]  }
 0x58c   :  { %1286 = vst [vmem:[#allocation11 + $0x20] sm:$0xff] %v1284_v33  ;;  %v1294_v34 = vpack.c.bf16 %v1284_v33, %v1284_v33  ;;  %v2069_v33 = vld [vmem:[#allocation10 + $0xec] ss:$16 sps:$4 sm:$0xff]  }
 0x58e   :  { %1328 = vmatmul.mubr.bf16.vlgmr.msra.gmra.mrb[36].mxu0 %v1294_v34  ;;  %1369 = vmatmul.mubr.bf16.vlgmr.msra.gmra.mrb[36].mxu1 %v1294_v34  ;;  %v2070_v34 = vld [vmem:[#allocation10 + $0xe0] ss:$16 sps:$4 sm:$0xff]  }
 0x58f   :  { %1416 = vmatpush1.bf16.msra.mxu0 %v2705_v32  ;;  %1457 = vmatpush1.bf16.msra.mxu1 %v2708_v44 }
 0x590   :  { %1417 = vmatprep.subr.bf16.mxu0 %v2711_v62  ;;  %1458 = vmatprep.subr.bf16.mxu1 %v2714_v29 }
 0x591   :  { %1447 = vmatprep.mubr.bf16.mxu0 %v2898_v30  ;;  %1488 = vmatprep.mubr.bf16.mxu1 %v2898_v30 }
 0x593   :  { %1418 = vmatpush1.bf16.msra.mxu0 %v2719_v25  ;;  %1459 = vmatpush1.bf16.msra.mxu1 %v2722_v11 }
 0x594   :  { %1419 = vmatprep.subr.bf16.mxu0 %v2725_v35  ;;  %1460 = vmatprep.subr.bf16.mxu1 %v2728_v10 }
 0x597   :  { %1420 = vmatpush1.bf16.msra.mxu0 %v2731_v13  ;;  %1461 = vmatpush1.bf16.msra.mxu1 %v2734_v8 }
 0x598   :  { %1421 = vmatprep.subr.bf16.mxu0 %v2737_v12  ;;  %1462 = vmatprep.subr.bf16.mxu1 %v2740_v7 }
 0x59b   :  { %1422 = vmatpush1.bf16.msra.mxu0 %v2743_v23  ;;  %1463 = vmatpush1.bf16.msra.mxu1 %v2746_v22 }
 0x59c   :  { %1423 = vmatprep.subr.bf16.mxu0 %v2749_v31  ;;  %1464 = vmatprep.subr.bf16.mxu1 %v2752_v15 }
 0x59f   :  { %1424 = vmatpush1.bf16.msra.mxu0 %v2755_v38  ;;  %1465 = vmatpush1.bf16.msra.mxu1 %v2758_v39 }
 0x5a0   :  { %1425 = vmatprep.subr.bf16.mxu0 %v2761_v40  ;;  %1466 = vmatprep.subr.bf16.mxu1 %v2764_v41 }
 0x5a3   :  { %1426 = vmatpush1.bf16.msra.mxu0 %v2373_v58  ;;  %1467 = vmatpush1.bf16.msra.mxu1 %v2375_v59 }
 0x5a4   :  { %1427 = vmatprep.subr.bf16.mxu0 %v2379_v60  ;;  %1468 = vmatprep.subr.bf16.mxu1 %v2381_v61  ;;  %v2908_v60 = vld [vmem:[#allocation28_spill] sm:$0xff] }
 0x5a7   :  { %1428 = vmatpush1.bf16.msra.mxu0 %v2387_v63  ;;  %1469 = vmatpush1.bf16.msra.mxu1 %v2389_v1 }
 0x5a8   :  { %1429 = vmatprep.subr.bf16.mxu0 %v2393_v2  ;;  %1470 = vmatprep.subr.bf16.mxu1 %v2395_v3 }
 0x5ab   :  { %1430 = vmatpush1.bf16.msra.mxu0 %v2399_v4  ;;  %1471 = vmatpush1.bf16.msra.mxu1 %v2401_v5 }
 0x5ac   :  { %1535 = vmatprep.subr.bf16.mxu0 %v2691_v36  ;;  %1576 = vmatprep.subr.bf16.mxu1 %v2694_v37 }
 0x661   :  { %v1329_v58 = vpop.f32.mrb[36].mxu0  ;;  %v1370_v59 = vpop.f32.mrb[36].mxu1 }
 0x662   :  { %v1377_v61 = vadd.f32 %v1329_v58, %v2908_v60  ;;  %v1379_v63 = vadd.f32 %v1370_v59, %v2909_v42  ;;  %v1331_v43 = vpop.f32.mrb[37].mxu0  ;;  %v1372_v1 = vpop.f32.mrb[37].mxu1 }
 0x663   :  { %v1378_v2 = vadd.f32 %v1331_v43, %v2910_v45  ;;  %v1380_v3 = vadd.f32 %v1372_v1, %v2911_v46  ;;  %v1333_v47 = vpop.f32.mrb[38].mxu0  ;;  %v1374_v4 = vpop.f32.mrb[38].mxu1 }
 0x664   :  { %v1789_v48 = vmul.f32 -1.442695, %v1377_v61  ;;  %v1334_v5 = vpop.f32.mrb[39].mxu0  ;;  %v1375_v49 = vpop.f32.mrb[39].mxu1 }
 0x665   :  { %v1790_v36 = vmul.f32 -1.442695, %v1378_v2  ;;  %v1791_v37 = vmul.f32 -1.442695, %v1380_v3 }
 0x666   :  { %1992 = vpow2.f32 %v1789_v48 }
 0x667   :  { %1994 = vpow2.f32 %v1790_v36 }
 0x668   :  { %1996 = vpow2.f32 %v1791_v37  ;;  %v2916_v37 = vld [vmem:[#allocation36_spill] sm:$0xff] }
 0x669   :  { %1998 = vtanh.f32 %v1379_v63 }
 0x670   :  { %v1993_v50 = vpop.eup %1992 }
 0x671   :  { %v1995_v51 = vpop.eup %1994  ;;  %v1384_v52 = vadd.f32 1.0, %v1993_v50 }
 0x672   :  { %v1390_v54 = vadd.f32 1.0, %v1995_v51  ;;  %v1997_v55 = vpop.eup %1996  ;;  %v2917_v51 = vld [vmem:[#allocation37_spill] sm:$0xff] }
 0x673   :  { %2000 = vrcp.f32 %v1384_v52  ;;  %v1999_v56 = vpop.eup %1998  ;;  %v1397_v16 = vadd.f32 1.0, %v1997_v55 }
 0x674   :  { %2002 = vrcp.f32 %v1390_v54 }
 0x675   :  { %2004 = vrcp.f32 %v1397_v16 }
 0x67d   :  { %v2001_v57 = vpop.eup %2000 }
 0x67e   :  { %v2003_v6 = vpop.eup %2002  ;;  %v1401_v14 = vmul.f32 %v2001_v57, %v1999_v56  ;;  %v2918_v56 = vld [vmem:[#allocation38_spill] sm:$0xff] }
 0x67f   :  { %v1400_v18 = vmul.f32 %v2003_v6, %v2702_v26  ;;  %v2005_v19 = vpop.eup %2004  ;;  %v2066_v26 = vld [vmem:[#allocation10 + $0xc0] ss:$16 sps:$4 sm:$0xff]  }
 0x680   :  { %v2919_v6 = vld [vmem:[#allocation39_spill] sm:$0xff] }
 0x681   :  { %v2784_v17 = vadd.f32 %v1401_v14, %v1400_v18 }
 0x683   :  { %2006 = vtanh.f32 %v2784_v17 }
 0x68d   :  { %v2007_v0 = vpop.eup %2006 }
 0x68e   :  { %v1404_v20 = vmul.f32 %v2007_v0, %v2005_v19 }
 0x690   :  { %1406 = vst [vmem:[#allocation11 + $0x28] sm:$0xff] %v1404_v20  ;;  %v1414_v21 = vpack.c.bf16 %v1404_v20, %v1404_v20 }
 0x692   :  { %1448 = vmatmul.mubr.bf16.vlgmr.msra.gmra.mrb[40].mxu0 %v1414_v21  ;;  %1489 = vmatmul.mubr.bf16.vlgmr.msra.gmra.mrb[40].mxu1 %v1414_v21 }
 0x693   :  { %1536 = vmatpush1.bf16.msra.mxu0 %v2705_v32  ;;  %1577 = vmatpush1.bf16.msra.mxu1 %v2708_v44  ;;  %v2071_v32 = vld [vmem:[#allocation10 + $0xe8] ss:$16 sps:$4 sm:$0xff]  }
 0x694   :  { %1537 = vmatprep.subr.bf16.mxu0 %v2711_v62  ;;  %1578 = vmatprep.subr.bf16.mxu1 %v2714_v29  ;;  %v2912_v29 = vld [vmem:[#allocation32_spill] sm:$0xff] }
 0x695   :  { %1567 = vmatprep.mubr.bf16.mxu0 %v2898_v30  ;;  %1608 = vmatprep.mubr.bf16.mxu1 %v2898_v30  ;;  %v2062_v30 = vld [vmem:[#allocation10 + $0xa0] ss:$16 sps:$4 sm:$0xff]  }
 0x697   :  { %1538 = vmatpush1.bf16.msra.mxu0 %v2719_v25  ;;  %1579 = vmatpush1.bf16.msra.mxu1 %v2722_v11  ;;  %v2913_v11 = vld [vmem:[#allocation33_spill] sm:$0xff] }
 0x698   :  { %1539 = vmatprep.subr.bf16.mxu0 %v2725_v35  ;;  %1580 = vmatprep.subr.bf16.mxu1 %v2728_v10 }
 0x69b   :  { %1540 = vmatpush1.bf16.msra.mxu0 %v2731_v13  ;;  %1581 = vmatpush1.bf16.msra.mxu1 %v2734_v8  ;;  %v2914_v8 = vld [vmem:[#allocation34_spill] sm:$0xff] }
 0x69c   :  { %1541 = vmatprep.subr.bf16.mxu0 %v2737_v12  ;;  %1582 = vmatprep.subr.bf16.mxu1 %v2740_v7  ;;  %v2915_v7 = vld [vmem:[#allocation35_spill] sm:$0xff] }
 0x69f   :  { %1542 = vmatpush1.bf16.msra.mxu0 %v2743_v23  ;;  %1583 = vmatpush1.bf16.msra.mxu1 %v2746_v22 }
 0x6a0   :  { %1543 = vmatprep.subr.bf16.mxu0 %v2749_v31  ;;  %1584 = vmatprep.subr.bf16.mxu1 %v2752_v15 }
 0x6a3   :  { %1544 = vmatpush1.bf16.msra.mxu0 %v2755_v38  ;;  %1585 = vmatpush1.bf16.msra.mxu1 %v2758_v39 }
 0x6a4   :  { %1545 = vmatprep.subr.bf16.mxu0 %v2761_v40  ;;  %1586 = vmatprep.subr.bf16.mxu1 %v2764_v41 }
 0x6a7   :  { %1546 = vmatpush1.bf16.msra.mxu0 %v2062_v30  ;;  %1587 = vmatpush1.bf16.msra.mxu1 %v2063_v27 }
 0x6a8   :  { %1547 = vmatprep.subr.bf16.mxu0 %v2064_v9  ;;  %1588 = vmatprep.subr.bf16.mxu1 %v2065_v24 }
 0x6ab   :  { %1548 = vmatpush1.bf16.msra.mxu0 %v2066_v26  ;;  %1589 = vmatpush1.bf16.msra.mxu1 %v2067_v28 }
 0x6ac   :  { %1549 = vmatprep.subr.bf16.mxu0 %v2068_v53  ;;  %1590 = vmatprep.subr.bf16.mxu1 %v2069_v33 }
 0x6af   :  { %1550 = vmatpush1.bf16.msra.mxu0 %v2070_v34  ;;  %1591 = vmatpush1.bf16.msra.mxu1 %v2071_v32 }
 0x765   :  { %v1449_v44 = vpop.f32.mrb[40].mxu0  ;;  %v1490_v62 = vpop.f32.mrb[40].mxu1 }
 0x766   :  { %v1497_v25 = vadd.f32 %v1449_v44, %v2912_v29  ;;  %v1499_v35 = vadd.f32 %v1490_v62, %v2913_v11  ;;  %v1451_v10 = vpop.f32.mrb[41].mxu0  ;;  %v1492_v13 = vpop.f32.mrb[41].mxu1 }
 0x767   :  { %v1498_v12 = vadd.f32 %v1451_v10, %v2914_v8  ;;  %v1500_v23 = vadd.f32 %v1492_v13, %v2915_v7  ;;  %v1453_v22 = vpop.f32.mrb[42].mxu0  ;;  %v1494_v31 = vpop.f32.mrb[42].mxu1 }
 0x768   :  { %v1792_v15 = vmul.f32 -1.442695, %v1497_v25  ;;  %v1454_v38 = vpop.f32.mrb[43].mxu0  ;;  %v1495_v39 = vpop.f32.mrb[43].mxu1 }
 0x769   :  { %v1793_v40 = vmul.f32 -1.442695, %v1498_v12  ;;  %v1794_v41 = vmul.f32 -1.442695, %v1500_v23 }
 0x76a   :  { %2008 = vpow2.f32 %v1792_v15 }
 0x76b   :  { %2010 = vpow2.f32 %v1793_v40 }
 0x76c   :  { %2012 = vpow2.f32 %v1794_v41 }
 0x76d   :  { %2014 = vtanh.f32 %v1499_v35 }
 0x774   :  { %v2009_v58 = vpop.eup %2008 }
 0x775   :  { %v2011_v59 = vpop.eup %2010  ;;  %v1504_v60 = vadd.f32 1.0, %v2009_v58 }
 0x776   :  { %v1510_v61 = vadd.f32 1.0, %v2011_v59  ;;  %v2013_v42 = vpop.eup %2012 }
 0x777   :  { %2016 = vrcp.f32 %v1504_v60  ;;  %v2015_v63 = vpop.eup %2014  ;;  %v1517_v2 = vadd.f32 1.0, %v2013_v42 }
 0x778   :  { %2018 = vrcp.f32 %v1510_v61 }
 0x779   :  { %2020 = vrcp.f32 %v1517_v2 }
 0x781   :  { %v2017_v43 = vpop.eup %2016 }
 0x782   :  { %v2019_v1 = vpop.eup %2018  ;;  %v1521_v45 = vmul.f32 %v2017_v43, %v2015_v63 }
 0x783   :  { %v1520_v46 = vmul.f32 %v2019_v1, %v2784_v17  ;;  %v2021_v47 = vpop.eup %2020 }
 0x785   :  { %v1522_v3 = vadd.f32 %v1521_v45, %v1520_v46 }
 0x787   :  { %2022 = vtanh.f32 %v1522_v3 }
 0x791   :  { %v2023_v4 = vpop.eup %2022 }
 0x792   :  { %v1524_v48 = vmul.f32 %v2023_v4, %v2021_v47 }
 0x794   :  { %1526 = vst [vmem:[#allocation11 + $0x30] sm:$0xff] %v1524_v48  ;;  %v1534_v5 = vpack.c.bf16 %v1524_v48, %v1524_v48 }
 0x796   :  { %1568 = vmatmul.mubr.bf16.vlgmr.msra.gmra.mrb[44].mxu0 %v1534_v5  ;;  %1609 = vmatmul.mubr.bf16.vlgmr.msra.gmra.mrb[44].mxu1 %v1534_v5 }
 0x869   :  { %v1569_v49 = vpop.f32.mrb[44].mxu0  ;;  %v1610_v36 = vpop.f32.mrb[44].mxu1 }
 0x86a   :  { %v1617_v50 = vadd.f32 %v1569_v49, %v2916_v37  ;;  %v1619_v52 = vadd.f32 %v1610_v36, %v2917_v51  ;;  %v1571_v54 = vpop.f32.mrb[45].mxu0  ;;  %v1612_v55 = vpop.f32.mrb[45].mxu1 }
 0x86b   :  { %v1618_v57 = vadd.f32 %v1571_v54, %v2918_v56  ;;  %v1620_v14 = vadd.f32 %v1612_v55, %v2919_v6  ;;  %v1573_v16 = vpop.f32.mrb[46].mxu0  ;;  %v1614_v18 = vpop.f32.mrb[46].mxu1 }
 0x86c   :  { %v1795_v17 = vmul.f32 -1.442695, %v1617_v50  ;;  %v1574_v19 = vpop.f32.mrb[47].mxu0  ;;  %v1615_v0 = vpop.f32.mrb[47].mxu1 }
 0x86d   :  { %v1796_v20 = vmul.f32 -1.442695, %v1618_v57  ;;  %v1797_v21 = vmul.f32 -1.442695, %v1620_v14 }
 0x86e   :  { %2024 = vpow2.f32 %v1795_v17 }
 0x86f   :  { %2026 = vpow2.f32 %v1796_v20 }
 0x870   :  { %2028 = vpow2.f32 %v1797_v21 }
 0x871   :  { %2030 = vtanh.f32 %v1619_v52 }
 0x878   :  { %v2025_v30 = vpop.eup %2024 }
 0x879   :  { %v2027_v27 = vpop.eup %2026  ;;  %v1624_v9 = vadd.f32 1.0, %v2025_v30 }
 0x87a   :  { %v1630_v24 = vadd.f32 1.0, %v2027_v27  ;;  %v2029_v26 = vpop.eup %2028 }
 0x87b   :  { %2032 = vrcp.f32 %v1624_v9  ;;  %v2031_v28 = vpop.eup %2030  ;;  %v1637_v32 = vadd.f32 1.0, %v2029_v26 }
 0x87c   :  { %2034 = vrcp.f32 %v1630_v24 }
 0x87d   :  { %2036 = vrcp.f32 %v1637_v32 }
 0x885   :  { %v2033_v53 = vpop.eup %2032 }
 0x886   :  { %v2035_v33 = vpop.eup %2034  ;;  %v1641_v34 = vmul.f32 %v2033_v53, %v2031_v28 }
 0x887   :  { %v1640_v44 = vmul.f32 %v2035_v33, %v1522_v3  ;;  %v2037_v29 = vpop.eup %2036 }
 0x889   :  { %v1642_v62 = vadd.f32 %v1641_v34, %v1640_v44 }
 0x88b   :  { %2038 = vtanh.f32 %v1642_v62  ;;  %1653 = vst [vmem:[#allocation14] sm:$0xff] %v1642_v62 }
 0x895   :  { %v2039_v25 = vpop.eup %2038 }
 0x896   :  { %v1644_v11 = vmul.f32 %v2039_v25, %v2037_v29 }
 0x898   :  { %1646 = vst [vmem:[#allocation11 + $0x38] sm:$0xff] %v1644_v11  ;;  %1652 = vst [vmem:[#allocation12] sm:$0xff] %v1644_v11 }
 0x899   :  { %2149 = shalt.err (!%p2146_p0)
}
 0x89a   :  { %s2150_s20 = scalar_lea.hbm %s2873_s5, 128 }
 0x89b   :  { %p2151_p1 = scmp.ne.s32.totalorder %s2873_s5, %s2150_s20  ;;  %p2154_p2 = scmp.lt.u32.totalorder %s2150_s20, %s2873_s5 }
 0x89d   :  { %p2156_p3 = pnand %p2154_p2, %p2151_p1 }
 0x89f   :  { %2159 = shalt.err (!%p2156_p3)
}
 0x8a0   :  { %1675 = dma.vmem_to_hbm [thread:$0]  %s1673_s8, 128, %s2873_s5, [#allocation13]  }
 0x8a1   :  { %s2160_s26 = scalar_lea.vmem %s2818_s14, 1024  ;;  %p2165_p5 = scmp.lt.s32.totalorder %s2818_s14, %s2818_s14 }
 0x8a2   :  { %p2161_p4 = scmp.ne.s32.totalorder %s2818_s14, %s2160_s26  ;;  %p2166_p6 = scmp.lt.s32.totalorder %s2160_s26, %s2160_s26 }
 0x8a4   :  { %p2167_p7 = por %p2166_p6, %p2165_p5 }
 0x8a6   :  { %p2168_p8 = pnand %p2167_p7, %p2161_p4 }
 0x8a8   :  { %2171 = shalt.err (!%p2168_p8)
}
 0x8a9   :  { %s2172_s29 = scalar_lea.hbm %s2872_s4, 1024 }
 0x8aa   :  { %p2173_p9 = scmp.ne.s32.totalorder %s2872_s4, %s2172_s29  ;;  %p2176_p10 = scmp.lt.u32.totalorder %s2172_s29, %s2872_s4 }
 0x8ac   :  { %p2178_p11 = pnand %p2176_p10, %p2173_p9 }
 0x8ae   :  { %2181 = shalt.err (!%p2178_p11)
}
 0x8af   :  { %s2224_s5 = smov 128   ;;  %s2225_s0 = smov 8  }
 0x8b0   :  { %1665 = dma.vmem_to_hbm [thread:$0]  %s2818_s14, 1024, %s2872_s4, [#allocation7], %s2224_s5, %s2224_s5, %s2225_s0  }
 0x8b1   :  { %s2182_s7 = scalar_lea.vmem %s2820_s16, 128  ;;  %p2187_p13 = scmp.lt.s32.totalorder %s2820_s16, %s2820_s16 }
 0x8b2   :  { %p2183_p12 = scmp.ne.s32.totalorder %s2820_s16, %s2182_s7  ;;  %p2188_p0 = scmp.lt.s32.totalorder %s2182_s7, %s2182_s7 }
 0x8b4   :  { %p2189_p1 = por %p2188_p0, %p2187_p13 }
 0x8b6   :  { %p2190_p2 = pnand %p2189_p1, %p2183_p12 }
 0x8b8   :  { %2193 = shalt.err (!%p2190_p2)
}
 0x8b9   :  { %s2194_s13 = scalar_lea.hbm %s2874_s6, 128 }
 0x8ba   :  { %p2195_p3 = scmp.ne.s32.totalorder %s2874_s6, %s2194_s13  ;;  %p2198_p4 = scmp.lt.u32.totalorder %s2194_s13, %s2874_s6 }
 0x8bc   :  { %p2200_p5 = pnand %p2198_p4, %p2195_p3 }
 0x8be   :  { %2203 = shalt.err (!%p2200_p5)
}
 0x8bf   :  { %1685 = dma.vmem_to_hbm [thread:$0]  %s2820_s16, 128, %s2874_s6, [#allocation13]  }
 0x8c0   :  { %2208 = dma.done.wait [#allocation7], 1024  }
 0x8c1   :  { %2209 = vsyncadd [#allocation7], 4294966272 }
 0x8c2   :  { %2210 = dma.done.wait [#allocation13], 256  }
 0x8c3   :  { %2211 = vsyncadd [#allocation13], 4294967040 }
 0x8c4   :  { %1695 = vsyncpa [#allocation6], 1 }
 0x8c5   :  { %1696 = vsyncpa [#allocation9], 1 }
 0x8c6   :  { %1697 = vsyncpa [#allocation7], 1 }
 0x8c7   :  { %1698 = vsyncpa [#allocation13], 1 }

</bundles_post_ra>
